<compile_context>
chip_gen: v5e
topology: v5e:2x2
jax: 0.10.0
libtpu: 0.0.40
codegen_flags: <defaults>
</compile_context>

<pallas_src>
import functools

import jax
import jax.numpy as jnp
from jax.experimental import pallas as pl
from jax.experimental.pallas import tpu as pltpu

ACT_DTYPE = jnp.bfloat16   # set to jnp.float32 for exact-f32 numerics
_ACT_BYTES = 2 if ACT_DTYPE == jnp.bfloat16 else 4


# ---------------------------------------------------------------------------
# Hardware-derived budgets (with safe fallbacks).
# ---------------------------------------------------------------------------
@functools.lru_cache(maxsize=None)
def _tpu_vmem_bytes():
    try:
        return int(pltpu.get_tpu_info().vmem_capacity_bytes)
    except Exception:
        return 128 * 1024 * 1024


@functools.lru_cache(maxsize=None)
def _tpu_cores_per_device():
    try:
        return max(1, int(getattr(jax.devices()[0], "num_cores", 1)))
    except Exception:
        return 1


def _vmem_limit_bytes():
    phys = _tpu_vmem_bytes()
    # leave headroom for the compiler; 96-100 MiB on 128 MiB parts, 32 MiB on 64 MiB parts
    return int(min(max(phys - 32 * 1024 * 1024, 32 * 1024 * 1024), 100 * 1024 * 1024))


def _strip_budget_bytes():
    return int(0.5 * _vmem_limit_bytes())


# ---------------------------------------------------------------------------
# Small helpers.
# ---------------------------------------------------------------------------
def _mish_f32(x):
    """mish(x) = x * tanh(softplus(x)) = x * n / (n + 2) with n = e^x * (e^x + 2).

    One exp (EUP) + one approximate reciprocal (EUP) + a few VPU ops; error is well
    below bf16 resolution of the stored activations.
    """
    u = jnp.exp(jnp.minimum(x, 20.0))
    n = u * (u + 2.0)
    return x * n * pl.reciprocal(n + 2.0, approx=True)


def _fold_bn(gamma, beta, mean, var, eps=1e-5):
    scale = gamma / jnp.sqrt(var + eps)
    bias = beta - mean * scale
    return scale, bias


def _pick_px_tile(total_px, per_px_bytes, budget):
    """Largest multiple of 128 dividing total_px that fits the per-step budget."""
    target = max(128, min(int(budget // max(per_px_bytes, 1)), 16384))
    cand = (min(total_px, target) // 128) * 128
    while cand >= 128:
        if total_px % cand == 0:
            return cand
        cand -= 128
    return total_px  # tiny images: full-extent block (still legal)


def _pick_row_strip(height, width, batch, per_row_bytes, budget, cores):
    """Output rows per strip: divides H, lane-dense (rows*W % 128 == 0), fits the
    VMEM budget, and prefers >= 2*cores grid steps for megacore balance."""
    max_rows = min(height, 64)
    cands = [d for d in range(1, max_rows + 1)
             if height % d == 0 and (d * width) % 128 == 0
             and (d >= 2 or height == 1)]
    if not cands:
        return height
    fit = [d for d in cands if d * per_row_bytes <= budget] or [min(cands)]
    min_prog = 2 * max(1, cores)
    good = [d for d in fit if batch * (height // d) >= min_prog]
    return max(good) if good else max(fit)


# ---------------------------------------------------------------------------
# Kernel 1: stem 1x1 conv (BN scale folded into weights) + bias + Mish.
#   x: (N, Cin, HW)   w: (Cout, Cin)   b: (Cout, 1)  ->  (N, Cout, HW)
# ---------------------------------------------------------------------------
def conv1x1_bn_mish(x, w, b):
    n, cin, hw = x.shape
    cout = w.shape[0]
    per_px = int(1.3 * (2 * cin * _ACT_BYTES + 2 * cout * _ACT_BYTES + 4 * cout))
    tpx = _pick_px_tile(hw, per_px, _strip_budget_bytes())

    def kernel(x_ref, w_ref, b_ref, o_ref):
        acc = jnp.dot(w_ref[...], x_ref[0], preferred_element_type=jnp.float32)
        o_ref[0] = _mish_f32(acc + b_ref[...]).astype(o_ref.dtype)

    return pl.pallas_call(
        kernel,
        out_shape=jax.ShapeDtypeStruct((n, cout, hw), x.dtype),
        grid_spec=pltpu.PrefetchScalarGridSpec(
            num_scalar_prefetch=0,
            grid=(n, hw // tpx),
            in_specs=[
                pl.BlockSpec((1, cin, tpx), lambda i, j: (i, 0, j)),
                pl.BlockSpec((cout, cin), lambda i, j: (0, 0)),
                pl.BlockSpec((cout, 1), lambda i, j: (0, 0)),
            ],
            out_specs=pl.BlockSpec((1, cout, tpx), lambda i, j: (i, 0, j)),
        ),
        compiler_params=pltpu.CompilerParams(
            dimension_semantics=("parallel", "parallel"),
            vmem_limit_bytes=_vmem_limit_bytes(),
        ),
    )(x, w, b)


# ---------------------------------------------------------------------------
# Kernel 2: fused ResidualBlock, channel-major row strips.
#   out = x + mish(conv3x3'(mish(conv1x1'(x) + b1)) + b2)   (BN scales folded into w)
#   x: (N, C, H*W);  p1.w: (Cmid, C);  p2.w: (9, Cout, Cmid) taps in ky*3+kx order.
# ---------------------------------------------------------------------------
def residual_block_fused(x, p1, p2, *, height, width):
    n, c, hw = x.shape
    assert hw == height * width
    cmid = p1["w"].shape[0]
    cout = p2["w"].shape[1]
    assert cout == c, "residual add requires out_channel == in_channel"

    per_px = int(1.3 * (2 * c * _ACT_BYTES + 2 * cout * _ACT_BYTES
                        + cmid * (4 + 3 * _ACT_BYTES) + 8 * cout))
    w_bytes = 2 * (cmid * c + 9 * cout * cmid) * _ACT_BYTES
    budget = max(_strip_budget_bytes() - w_bytes, 256 * 1024)
    tr = _pick_row_strip(height, width, n, width * per_px, budget,
                         _tpu_cores_per_device())
    n_strips = height // tr
    tpx = tr * width

    # Precomputed edge masks (grid-invariant, constant-folded at compile time):
    #   row 0: not-first-row-of-strip, row 1: not-last-row, row 2: col != 0,
    #   row 3: col != W-1.
    rows = jnp.arange(tr)
    cols = jnp.arange(width)
    masks = jnp.stack([
        jnp.repeat(rows > 0, width),
        jnp.repeat(rows < tr - 1, width),
        jnp.tile(cols > 0, tr),
        jnp.tile(cols < width - 1, tr),
    ]).astype(jnp.float32)                                    # (4, tpx)

    # Halo rows of x per strip (row above and row below; zeros outside the image).
    # Tiny side input (~2/tr of x); only contiguous slices + one small transpose.
    x5 = x.reshape(n, c, n_strips, tpx)
    zrow = jnp.zeros((n, c, 1, width), x.dtype)
    above = jnp.concatenate([zrow, x5[:, :, :-1, tpx - width:]], axis=2)  # (n,c,S,W)
    below = jnp.concatenate([x5[:, :, 1:, :width], zrow], axis=2)         # (n,c,S,W)
    halos = jnp.concatenate([above, below], axis=3)                       # (n,c,S,2W)
    halos = jnp.transpose(halos, (0, 2, 1, 3))                            # (n,S,c,2W)

    w1 = p1["w"]                       # (cmid, c), ACT_DTYPE, BN1 scale folded
    b1 = p1["b"]                       # (cmid, 1), f32
    w2 = p2["w"]                       # (9, cout, cmid), ACT_DTYPE, BN2 scale folded
    b2 = p2["b"]                       # (cout, 1), f32

    def kernel(xm_ref, xh_ref, mask_ref, w1_ref, b1_ref, w2_ref, b2_ref, o_ref):
        s = pl.program_id(1)
        v_top = (s > 0).astype(jnp.float32)
        v_bot = (s < pl.num_programs(1) - 1).astype(jnp.float32)

        row_nf = mask_ref[0:1, :]
        row_nl = mask_ref[1:2, :]
        col_nf = mask_ref[2:3, :]
        col_nl = mask_ref[3:4, :]

        # --- 1x1 conv (scale-folded) + bias + mish -> mid (f32)
        mid = _mish_f32(
            jnp.dot(w1_ref[...], xm_ref[0], preferred_element_type=jnp.float32)
            + b1_ref[...])                                    # (cmid, tpx)
        # dy-shifted copies via XLU roll; wrapped rows zeroed (halo handled below).
        mid_b = mid.astype(ACT_DTYPE)
        mid_u = (pltpu.roll(mid, width, 1) * row_nf).astype(ACT_DTYPE)    # row r -> r-1
        mid_d = (pltpu.roll(mid, tpx - width, 1) * row_nl).astype(ACT_DTYPE)  # r -> r+1

        # halo rows: 1x1+mish on the two x rows adjacent to the strip (zero outside).
        mid_h = _mish_f32(
            jnp.dot(w1_ref[...], xh_ref[0, 0], preferred_element_type=jnp.float32)
            + b1_ref[...])                                    # (cmid, 2W)
        mid_top = (mid_h[:, :width] * v_top).astype(ACT_DTYPE)
        mid_bot = (mid_h[:, width:] * v_bot).astype(ACT_DTYPE)

        # --- 3x3 conv: 9 MXU matmuls grouped by dx; dy realized on the inputs (rolls
        # above), dx realized on the output partial via roll + precomputed edge mask.
        def conv_dx(dx):
            r = jnp.dot(w2_ref[dx], mid_u, preferred_element_type=jnp.float32)
            r = r + jnp.dot(w2_ref[3 + dx], mid_b, preferred_element_type=jnp.float32)
            r = r + jnp.dot(w2_ref[6 + dx], mid_d, preferred_element_type=jnp.float32)
            return r

        acc = conv_dx(1)
        acc = acc + pltpu.roll(conv_dx(0), 1, 1) * col_nf
        acc = acc + pltpu.roll(conv_dx(2), tpx - 1, 1) * col_nl

        # --- epilogue: bias + mish + residual (x re-read just before the add).
        y = _mish_f32(acc + b2_ref[...])
        o_ref[0] = (xm_ref[0].astype(jnp.float32) + y).astype(o_ref.dtype)

        # --- boundary rows: add the halo-row taps (dy=-1 on row 0, dy=+1 on last row)
        # with 3 tiny (Cout, W) matmuls each; tiny jnp.roll for the +-1 column shift.
        def edge_taps(tap_base, mid_edge):
            t1 = jnp.dot(w2_ref[tap_base + 1], mid_edge,
                         preferred_element_type=jnp.float32)
            t0 = jnp.dot(w2_ref[tap_base + 0], mid_edge,
                         preferred_element_type=jnp.float32)
            t2 = jnp.dot(w2_ref[tap_base + 2], mid_edge,
                         preferred_element_type=jnp.float32)
            return (t1 + jnp.roll(t0, 1, axis=1) * col_nf[:, :width]
                    + jnp.roll(t2, width - 1, axis=1) * col_nl[:, :width])

        def apply_edge(t, off):
            a = acc[:, off:off + width] + t
            yb = _mish_f32(a + b2_ref[...])
            xb = xm_ref[0, :, pl.ds(off, width)].astype(jnp.float32)
            o_ref[0, :, pl.ds(off, width)] = (xb + yb).astype(o_ref.dtype)

        t_top = edge_taps(0, mid_top)
        t_bot = edge_taps(6, mid_bot)
        if tr > 1:
            apply_edge(t_top, 0)
            apply_edge(t_bot, tpx - width)
        else:
            apply_edge(t_top + t_bot, 0)

    return pl.pallas_call(
        kernel,
        out_shape=jax.ShapeDtypeStruct((n, cout, hw), x.dtype),
        grid_spec=pltpu.PrefetchScalarGridSpec(
            num_scalar_prefetch=0,
            grid=(n, n_strips),
            in_specs=[
                pl.BlockSpec((1, c, tpx), lambda i, j: (i, 0, j)),
                pl.BlockSpec((1, 1, c, 2 * width), lambda i, j: (i, j, 0, 0)),
                pl.BlockSpec((4, tpx), lambda i, j: (0, 0)),
                pl.BlockSpec((cmid, c), lambda i, j: (0, 0)),
                pl.BlockSpec((cmid, 1), lambda i, j: (0, 0)),
                pl.BlockSpec((9, cout, cmid), lambda i, j: (0, 0, 0)),
                pl.BlockSpec((cout, 1), lambda i, j: (0, 0)),
            ],
            out_specs=pl.BlockSpec((1, cout, tpx), lambda i, j: (i, 0, j)),
        ),
        compiler_params=pltpu.CompilerParams(
            dimension_semantics=("parallel", "parallel"),
            vmem_limit_bytes=_vmem_limit_bytes(),
        ),
    )(x, halos, masks, w1, b1, w2, b2)


# ---------------------------------------------------------------------------
# Parameter construction (deterministic, synthetic). BN is folded: scale into the
# conv weights (stored in ACT_DTYPE), bias kept as a (Cout, 1) f32 epilogue add.
# Layouts are pre-transposed for channel-major matmuls:
#   1x1: (Cout, Cin);  3x3: (9, Cout, Cin) with taps in (ky*3 + kx) order.
# ---------------------------------------------------------------------------
def make_csp_params(key, in_channel, out_channel, num_resblocks, downsample=False):
    intermed = out_channel // 2 if downsample else out_channel
    keys = jax.random.split(key, 1 + 2 * num_resblocks)

    def conv_params(k, cin, cout, ksize):
        k1, k2, k3 = jax.random.split(k, 3)
        if ksize == 1:
            wt = jax.random.normal(k1, (cout, cin), jnp.float32) * 0.1
        else:
            wt = jax.random.normal(k1, (ksize * ksize, cout, cin), jnp.float32) * 0.1
        gamma = 1.0 + 0.1 * jax.random.normal(k2, (cout,), jnp.float32)
        beta = 0.1 * jax.random.normal(k3, (cout,), jnp.float32)
        mean = jnp.zeros((cout,), jnp.float32)
        var = jnp.ones((cout,), jnp.float32)
        scale, bias = _fold_bn(gamma, beta, mean, var)
        if ksize == 1:
            wf = wt * scale[:, None]
        else:
            wf = wt * scale[None, :, None]
        return {"w": wf.astype(ACT_DTYPE),
                "b": bias.reshape(cout, 1).astype(jnp.float32)}

    params = {"stem": conv_params(keys[0], in_channel, out_channel, 1), "blocks": []}
    for i in range(num_resblocks):
        p1 = conv_params(keys[1 + 2 * i], out_channel, intermed, 1)
        p2 = conv_params(keys[2 + 2 * i], intermed, out_channel, 3)
        params["blocks"].append({"conv1": p1, "conv2": p2})
    return params


@jax.jit
def csp_block_forward(x_nchw, params):
    n, cin, h, w = x_nchw.shape
    # PyTorch NCHW is already channel-major: flatten the spatial axes so the lane
    # axis is H*W (lane-dense).  Activations stored in ACT_DTYPE between kernels.
    out = x_nchw.reshape(n, cin, h * w).astype(ACT_DTYPE)
    st = params["stem"]
    out = conv1x1_bn_mish(out, st["w"], st["b"])
    for blk in params["blocks"]:
        out = residual_block_fused(out, blk["conv1"], blk["conv2"],
                                   height=h, width=w)
    return out.reshape(n, -1, h, w).astype(x_nchw.dtype)


if __name__ == "__main__":
    N, Cin, H, W = 2, 4, 16, 16
    Cout, num_resblocks = 8, 2

    key = jax.random.PRNGKey(0)
    kx, kp = jax.random.split(key)
    x = jax.random.normal(kx, (N, Cin, H, W), jnp.float32)
    params = make_csp_params(kp, Cin, Cout, num_resblocks, downsample=False)

    out = csp_block_forward(x, params)
    jax.block_until_ready(out)
    assert out.shape == (N, Cout, H, W), out.shape
    assert bool(jnp.all(jnp.isfinite(out)))
    print("KERNEL_OK")
</pallas_src>

<mosaic_0001>
module attributes {stable_mosaic.version = 11 : i64} {
  func.func @kernel(%arg0: i32, %arg1: i32, %arg2: memref<1x4x256xbf16, #tpu.memory_space<vmem>>, %arg3: memref<8x4xbf16, #tpu.memory_space<vmem>>, %arg4: memref<8x1xf32, #tpu.memory_space<vmem>>, %arg5: memref<1x8x256xbf16, #tpu.memory_space<vmem>>) attributes {dimension_semantics = [#tpu.dimension_semantics<parallel>, #tpu.dimension_semantics<parallel>], iteration_bounds = array<i64: 2, 1>, scalar_prefetch = 0 : i64, scratch_operands = 0 : i64, tpu.core_type = #tpu.core_type<tc>, window_params = [{transform_indices = @transform_0, window_bounds = array<i64: 1, 4, 256>}, {pipeline_mode = #tpu.pipeline_mode<synchronous>, transform_indices = @transform_1, window_bounds = array<i64: 8, 4>}, {pipeline_mode = #tpu.pipeline_mode<synchronous>, transform_indices = @transform_2, window_bounds = array<i64: 8, 1>}, {transform_indices = @transform_3, window_bounds = array<i64: 1, 8, 256>}]} {
    %c0 = arith.constant 0 : index
    %c0_0 = arith.constant 0 : index
    %0 = vector.load %arg3[%c0, %c0_0] : memref<8x4xbf16, #tpu.memory_space<vmem>>, vector<8x4xbf16>
    %c0_1 = arith.constant 0 : index
    %c0_2 = arith.constant 0 : index
    %c0_3 = arith.constant 0 : index
    %1 = vector.load %arg2[%c0_1, %c0_2, %c0_3] : memref<1x4x256xbf16, #tpu.memory_space<vmem>>, vector<1x4x256xbf16>
    %2 = vector.shape_cast %1 : vector<1x4x256xbf16> to vector<4x256xbf16>
    %cst = arith.constant dense<0.000000e+00> : vector<8x256xf32>
    %3 = tpu.matmul %0, %2, %cst {dimension_numbers = #tpu.dot_dimension_numbers<[1], [0], [0], [1], [0, 0, 1, 1], [], []>} : vector<8x4xbf16>, vector<4x256xbf16>, vector<8x256xf32> -> vector<8x256xf32>
    %c0_4 = arith.constant 0 : index
    %c0_5 = arith.constant 0 : index
    %4 = vector.load %arg4[%c0_4, %c0_5] : memref<8x1xf32, #tpu.memory_space<vmem>>, vector<8x1xf32>
    %5 = vector.broadcast %4 : vector<8x1xf32> to vector<8x256xf32>
    %6 = arith.addf %3, %5 : vector<8x256xf32>
    %cst_6 = arith.constant 2.000000e+01 : f32
    %7 = vector.broadcast %cst_6 : f32 to vector<8x256xf32>
    %8 = arith.minimumf %6, %7 : vector<8x256xf32>
    %9 = math.exp %8 : vector<8x256xf32>
    %cst_7 = arith.constant 2.000000e+00 : f32
    %10 = vector.broadcast %cst_7 : f32 to vector<8x256xf32>
    %11 = arith.addf %9, %10 : vector<8x256xf32>
    %12 = arith.mulf %9, %11 : vector<8x256xf32>
    %13 = arith.mulf %6, %12 : vector<8x256xf32>
    %cst_8 = arith.constant 2.000000e+00 : f32
    %14 = vector.broadcast %cst_8 : f32 to vector<8x256xf32>
    %15 = arith.addf %12, %14 : vector<8x256xf32>
    %16 = tpu.reciprocal %15 {approx = true} : vector<8x256xf32> -> vector<8x256xf32>
    %17 = arith.mulf %13, %16 : vector<8x256xf32>
    %18 = arith.truncf %17 : vector<8x256xf32> to vector<8x256xbf16>
    %c0_9 = arith.constant 0 : index
    %c0_10 = arith.constant 0 : index
    %c0_11 = arith.constant 0 : index
    %19 = vector.load %arg5[%c0_9, %c0_10, %c0_11] : memref<1x8x256xbf16, #tpu.memory_space<vmem>>, vector<1x8x256xbf16>
    %20 = vector.shape_cast %19 : vector<1x8x256xbf16> to vector<8x256xbf16>
    %21 = vector.shape_cast %18 : vector<8x256xbf16> to vector<1x8x256xbf16>
    tpu.vector_store %arg5[%c0_9, %c0_10, %c0_11], %21 {strides = array<i32>} : memref<1x8x256xbf16, #tpu.memory_space<vmem>>, vector<1x8x256xbf16>,
    return
  }
  func.func @transform_0(%arg0: i32, %arg1: i32) -> (i32, i32, i32) {
    %c0_i32 = arith.constant 0 : i32
    %c0_i32_0 = arith.constant 0 : i32
    return %arg0, %c0_i32, %arg1 : i32, i32, i32
  }
  func.func @transform_1(%arg0: i32, %arg1: i32) -> (i32, i32) {
    %c0_i32 = arith.constant 0 : i32
    %c0_i32_0 = arith.constant 0 : i32
    %c0_i32_1 = arith.constant 0 : i32
    return %c0_i32, %c0_i32_0 : i32, i32
  }
  func.func @transform_2(%arg0: i32, %arg1: i32) -> (i32, i32) {
    %c0_i32 = arith.constant 0 : i32
    %c0_i32_0 = arith.constant 0 : i32
    %c0_i32_1 = arith.constant 0 : i32
    return %c0_i32, %c0_i32_0 : i32, i32
  }
  func.func @transform_3(%arg0: i32, %arg1: i32) -> (i32, i32, i32) {
    %c0_i32 = arith.constant 0 : i32
    %c0_i32_0 = arith.constant 0 : i32
    return %arg0, %c0_i32, %arg1 : i32, i32, i32
  }
}

module attributes {stable_mosaic.version = 11 : i64} {
  func.func @kernel(%arg0: i32, %arg1: i32, %arg2: memref<1x8x256xbf16, #tpu.memory_space<vmem>>, %arg3: memref<1x1x8x32xbf16, #tpu.memory_space<vmem>>, %arg4: memref<4x256xf32, #tpu.memory_space<vmem>>, %arg5: memref<8x8xbf16, #tpu.memory_space<vmem>>, %arg6: memref<8x1xf32, #tpu.memory_space<vmem>>, %arg7: memref<9x8x8xbf16, #tpu.memory_space<vmem>>, %arg8: memref<8x1xf32, #tpu.memory_space<vmem>>, %arg9: memref<1x8x256xbf16, #tpu.memory_space<vmem>>) attributes {dimension_semantics = [#tpu.dimension_semantics<parallel>, #tpu.dimension_semantics<parallel>], iteration_bounds = array<i64: 2, 1>, scalar_prefetch = 0 : i64, scratch_operands = 0 : i64, tpu.core_type = #tpu.core_type<tc>, window_params = [{transform_indices = @transform_0, window_bounds = array<i64: 1, 8, 256>}, {transform_indices = @transform_1, window_bounds = array<i64: 1, 1, 8, 32>}, {pipeline_mode = #tpu.pipeline_mode<synchronous>, transform_indices = @transform_2, window_bounds = array<i64: 4, 256>}, {pipeline_mode = #tpu.pipeline_mode<synchronous>, transform_indices = @transform_3, window_bounds = array<i64: 8, 8>}, {pipeline_mode = #tpu.pipeline_mode<synchronous>, transform_indices = @transform_4, window_bounds = array<i64: 8, 1>}, {pipeline_mode = #tpu.pipeline_mode<synchronous>, transform_indices = @transform_5, window_bounds = array<i64: 9, 8, 8>}, {pipeline_mode = #tpu.pipeline_mode<synchronous>, transform_indices = @transform_6, window_bounds = array<i64: 8, 1>}, {transform_indices = @transform_7, window_bounds = array<i64: 1, 8, 256>}]} {
    %c0_i32 = arith.constant 0 : i32
    %0 = arith.cmpi sgt, %arg1, %c0_i32 : i32
    %1 = arith.extui %0 : i1 to i32
    %2 = arith.sitofp %1 : i32 to f32
    %c0_i32_0 = arith.constant 0 : i32
    %3 = arith.cmpi slt, %arg1, %c0_i32_0 : i32
    %4 = arith.extui %3 : i1 to i32
    %5 = arith.sitofp %4 : i32 to f32
    %c0 = arith.constant 0 : index
    %c0_1 = arith.constant 0 : index
    %6 = vector.load %arg4[%c0, %c0_1] : memref<4x256xf32, #tpu.memory_space<vmem>>, vector<1x256xf32>
    %c1 = arith.constant 1 : index
    %c0_2 = arith.constant 0 : index
    %7 = vector.load %arg4[%c1, %c0_2] : memref<4x256xf32, #tpu.memory_space<vmem>>, vector<1x256xf32>
    %c2 = arith.constant 2 : index
    %c0_3 = arith.constant 0 : index
    %8 = vector.load %arg4[%c2, %c0_3] : memref<4x256xf32, #tpu.memory_space<vmem>>, vector<1x256xf32>
    %c3 = arith.constant 3 : index
    %c0_4 = arith.constant 0 : index
    %9 = vector.load %arg4[%c3, %c0_4] : memref<4x256xf32, #tpu.memory_space<vmem>>, vector<1x256xf32>
    %c0_5 = arith.constant 0 : index
    %c0_6 = arith.constant 0 : index
    %10 = vector.load %arg5[%c0_5, %c0_6] : memref<8x8xbf16, #tpu.memory_space<vmem>>, vector<8x8xbf16>
    %c0_7 = arith.constant 0 : index
    %c0_8 = arith.constant 0 : index
    %c0_9 = arith.constant 0 : index
    %11 = vector.load %arg2[%c0_7, %c0_8, %c0_9] : memref<1x8x256xbf16, #tpu.memory_space<vmem>>, vector<1x8x256xbf16>
    %12 = vector.shape_cast %11 : vector<1x8x256xbf16> to vector<8x256xbf16>
    %cst = arith.constant dense<0.000000e+00> : vector<8x256xf32>
    %13 = tpu.matmul %10, %12, %cst {dimension_numbers = #tpu.dot_dimension_numbers<[1], [0], [0], [1], [0, 0, 1, 1], [], []>} : vector<8x8xbf16>, vector<8x256xbf16>, vector<8x256xf32> -> vector<8x256xf32>
    %c0_10 = arith.constant 0 : index
    %c0_11 = arith.constant 0 : index
    %14 = vector.load %arg6[%c0_10, %c0_11] : memref<8x1xf32, #tpu.memory_space<vmem>>, vector<8x1xf32>
    %15 = vector.broadcast %14 : vector<8x1xf32> to vector<8x256xf32>
    %16 = arith.addf %13, %15 : vector<8x256xf32>
    %cst_12 = arith.constant 2.000000e+01 : f32
    %17 = vector.broadcast %cst_12 : f32 to vector<8x256xf32>
    %18 = arith.minimumf %16, %17 : vector<8x256xf32>
    %19 = math.exp %18 : vector<8x256xf32>
    %cst_13 = arith.constant 2.000000e+00 : f32
    %20 = vector.broadcast %cst_13 : f32 to vector<8x256xf32>
    %21 = arith.addf %19, %20 : vector<8x256xf32>
    %22 = arith.mulf %19, %21 : vector<8x256xf32>
    %23 = arith.mulf %16, %22 : vector<8x256xf32>
    %cst_14 = arith.constant 2.000000e+00 : f32
    %24 = vector.broadcast %cst_14 : f32 to vector<8x256xf32>
    %25 = arith.addf %22, %24 : vector<8x256xf32>
    %26 = tpu.reciprocal %25 {approx = true} : vector<8x256xf32> -> vector<8x256xf32>
    %27 = arith.mulf %23, %26 : vector<8x256xf32>
    %28 = arith.truncf %27 : vector<8x256xf32> to vector<8x256xbf16>
    %c16_i32 = arith.constant 16 : i32
    %29 = tpu.dynamic_rotate %27 by %c16_i32 dim 1 : vector<8x256xf32>, i32 -> vector<8x256xf32>
    %30 = vector.broadcast %6 : vector<1x256xf32> to vector<8x256xf32>
    %31 = arith.mulf %29, %30 : vector<8x256xf32>
    %32 = arith.truncf %31 : vector<8x256xf32> to vector<8x256xbf16>
    %c240_i32 = arith.constant 240 : i32
    %33 = tpu.dynamic_rotate %27 by %c240_i32 dim 1 : vector<8x256xf32>, i32 -> vector<8x256xf32>
    %34 = vector.broadcast %7 : vector<1x256xf32> to vector<8x256xf32>
    %35 = arith.mulf %33, %34 : vector<8x256xf32>
    %36 = arith.truncf %35 : vector<8x256xf32> to vector<8x256xbf16>
    %c0_15 = arith.constant 0 : index
    %c0_16 = arith.constant 0 : index
    %37 = vector.load %arg5[%c0_15, %c0_16] : memref<8x8xbf16, #tpu.memory_space<vmem>>, vector<8x8xbf16>
    %c0_17 = arith.constant 0 : index
    %c0_18 = arith.constant 0 : index
    %c0_19 = arith.constant 0 : index
    %c0_20 = arith.constant 0 : index
    %38 = vector.load %arg3[%c0_17, %c0_18, %c0_19, %c0_20] : memref<1x1x8x32xbf16, #tpu.memory_space<vmem>>, vector<1x1x8x32xbf16>
    %39 = vector.shape_cast %38 : vector<1x1x8x32xbf16> to vector<8x32xbf16>
    %cst_21 = arith.constant dense<0.000000e+00> : vector<8x32xf32>
    %40 = tpu.matmul %37, %39, %cst_21 {dimension_numbers = #tpu.dot_dimension_numbers<[1], [0], [0], [1], [0, 0, 1, 1], [], []>} : vector<8x8xbf16>, vector<8x32xbf16>, vector<8x32xf32> -> vector<8x32xf32>
    %c0_22 = arith.constant 0 : index
    %c0_23 = arith.constant 0 : index
    %41 = vector.load %arg6[%c0_22, %c0_23] : memref<8x1xf32, #tpu.memory_space<vmem>>, vector<8x1xf32>
    %42 = vector.broadcast %41 : vector<8x1xf32> to vector<8x32xf32>
    %43 = arith.addf %40, %42 : vector<8x32xf32>
    %cst_24 = arith.constant 2.000000e+01 : f32
    %44 = vector.broadcast %cst_24 : f32 to vector<8x32xf32>
    %45 = arith.minimumf %43, %44 : vector<8x32xf32>
    %46 = math.exp %45 : vector<8x32xf32>
    %cst_25 = arith.constant 2.000000e+00 : f32
    %47 = vector.broadcast %cst_25 : f32 to vector<8x32xf32>
    %48 = arith.addf %46, %47 : vector<8x32xf32>
    %49 = arith.mulf %46, %48 : vector<8x32xf32>
    %50 = arith.mulf %43, %49 : vector<8x32xf32>
    %cst_26 = arith.constant 2.000000e+00 : f32
    %51 = vector.broadcast %cst_26 : f32 to vector<8x32xf32>
    %52 = arith.addf %49, %51 : vector<8x32xf32>
    %53 = tpu.reciprocal %52 {approx = true} : vector<8x32xf32> -> vector<8x32xf32>
    %54 = arith.mulf %50, %53 : vector<8x32xf32>
    %55 = vector.extract_strided_slice %54 {offsets = [0, 0], sizes = [8, 16], strides = [1, 1]} : vector<8x32xf32> to vector<8x16xf32>
    %56 = vector.broadcast %2 : f32 to vector<8x16xf32>
    %57 = arith.mulf %55, %56 : vector<8x16xf32>
    %58 = arith.truncf %57 : vector<8x16xf32> to vector<8x16xbf16>
    %59 = vector.extract_strided_slice %54 {offsets = [0, 16], sizes = [8, 16], strides = [1, 1]} : vector<8x32xf32> to vector<8x16xf32>
    %60 = vector.broadcast %5 : f32 to vector<8x16xf32>
    %61 = arith.mulf %59, %60 : vector<8x16xf32>
    %62 = arith.truncf %61 : vector<8x16xf32> to vector<8x16xbf16>
    %c1_27 = arith.constant 1 : index
    %c0_28 = arith.constant 0 : index
    %c0_29 = arith.constant 0 : index
    %63 = vector.load %arg7[%c1_27, %c0_28, %c0_29] : memref<9x8x8xbf16, #tpu.memory_space<vmem>>, vector<1x8x8xbf16>
    %64 = vector.shape_cast %63 : vector<1x8x8xbf16> to vector<8x8xbf16>
    %cst_30 = arith.constant dense<0.000000e+00> : vector<8x256xf32>
    %65 = tpu.matmul %64, %32, %cst_30 {dimension_numbers = #tpu.dot_dimension_numbers<[1], [0], [0], [1], [0, 0, 1, 1], [], []>} : vector<8x8xbf16>, vector<8x256xbf16>, vector<8x256xf32> -> vector<8x256xf32>
    %c4 = arith.constant 4 : index
    %c0_31 = arith.constant 0 : index
    %c0_32 = arith.constant 0 : index
    %66 = vector.load %arg7[%c4, %c0_31, %c0_32] : memref<9x8x8xbf16, #tpu.memory_space<vmem>>, vector<1x8x8xbf16>
    %67 = vector.shape_cast %66 : vector<1x8x8xbf16> to vector<8x8xbf16>
    %cst_33 = arith.constant dense<0.000000e+00> : vector<8x256xf32>
    %68 = tpu.matmul %67, %28, %cst_33 {dimension_numbers = #tpu.dot_dimension_numbers<[1], [0], [0], [1], [0, 0, 1, 1], [], []>} : vector<8x8xbf16>, vector<8x256xbf16>, vector<8x256xf32> -> vector<8x256xf32>
    %69 = arith.addf %65, %68 : vector<8x256xf32>
    %c7 = arith.constant 7 : index
    %c0_34 = arith.constant 0 : index
    %c0_35 = arith.constant 0 : index
    %70 = vector.load %arg7[%c7, %c0_34, %c0_35] : memref<9x8x8xbf16, #tpu.memory_space<vmem>>, vector<1x8x8xbf16>
    %71 = vector.shape_cast %70 : vector<1x8x8xbf16> to vector<8x8xbf16>
    %cst_36 = arith.constant dense<0.000000e+00> : vector<8x256xf32>
    %72 = tpu.matmul %71, %36, %cst_36 {dimension_numbers = #tpu.dot_dimension_numbers<[1], [0], [0], [1], [0, 0, 1, 1], [], []>} : vector<8x8xbf16>, vector<8x256xbf16>, vector<8x256xf32> -> vector<8x256xf32>
    %73 = arith.addf %69, %72 : vector<8x256xf32>
    %c0_37 = arith.constant 0 : index
    %c0_38 = arith.constant 0 : index
    %c0_39 = arith.constant 0 : index
    %74 = vector.load %arg7[%c0_37, %c0_38, %c0_39] : memref<9x8x8xbf16, #tpu.memory_space<vmem>>, vector<1x8x8xbf16>
    %75 = vector.shape_cast %74 : vector<1x8x8xbf16> to vector<8x8xbf16>
    %cst_40 = arith.constant dense<0.000000e+00> : vector<8x256xf32>
    %76 = tpu.matmul %75, %32, %cst_40 {dimension_numbers = #tpu.dot_dimension_numbers<[1], [0], [0], [1], [0, 0, 1, 1], [], []>} : vector<8x8xbf16>, vector<8x256xbf16>, vector<8x256xf32> -> vector<8x256xf32>
    %c3_41 = arith.constant 3 : index
    %c0_42 = arith.constant 0 : index
    %c0_43 = arith.constant 0 : index
    %77 = vector.load %arg7[%c3_41, %c0_42, %c0_43] : memref<9x8x8xbf16, #tpu.memory_space<vmem>>, vector<1x8x8xbf16>
    %78 = vector.shape_cast %77 : vector<1x8x8xbf16> to vector<8x8xbf16>
    %cst_44 = arith.constant dense<0.000000e+00> : vector<8x256xf32>
    %79 = tpu.matmul %78, %28, %cst_44 {dimension_numbers = #tpu.dot_dimension_numbers<[1], [0], [0], [1], [0, 0, 1, 1], [], []>} : vector<8x8xbf16>, vector<8x256xbf16>, vector<8x256xf32> -> vector<8x256xf32>
    %80 = arith.addf %76, %79 : vector<8x256xf32>
    %c6 = arith.constant 6 : index
    %c0_45 = arith.constant 0 : index
    %c0_46 = arith.constant 0 : index
    %81 = vector.load %arg7[%c6, %c0_45, %c0_46] : memref<9x8x8xbf16, #tpu.memory_space<vmem>>, vector<1x8x8xbf16>
    %82 = vector.shape_cast %81 : vector<1x8x8xbf16> to vector<8x8xbf16>
    %cst_47 = arith.constant dense<0.000000e+00> : vector<8x256xf32>
    %83 = tpu.matmul %82, %36, %cst_47 {dimension_numbers = #tpu.dot_dimension_numbers<[1], [0], [0], [1], [0, 0, 1, 1], [], []>} : vector<8x8xbf16>, vector<8x256xbf16>, vector<8x256xf32> -> vector<8x256xf32>
    %84 = arith.addf %80, %83 : vector<8x256xf32>
    %c1_i32 = arith.constant 1 : i32
    %85 = tpu.dynamic_rotate %84 by %c1_i32 dim 1 : vector<8x256xf32>, i32 -> vector<8x256xf32>
    %86 = vector.broadcast %8 : vector<1x256xf32> to vector<8x256xf32>
    %87 = arith.mulf %85, %86 : vector<8x256xf32>
    %88 = arith.addf %73, %87 : vector<8x256xf32>
    %c2_48 = arith.constant 2 : index
    %c0_49 = arith.constant 0 : index
    %c0_50 = arith.constant 0 : index
    %89 = vector.load %arg7[%c2_48, %c0_49, %c0_50] : memref<9x8x8xbf16, #tpu.memory_space<vmem>>, vector<1x8x8xbf16>
    %90 = vector.shape_cast %89 : vector<1x8x8xbf16> to vector<8x8xbf16>
    %cst_51 = arith.constant dense<0.000000e+00> : vector<8x256xf32>
    %91 = tpu.matmul %90, %32, %cst_51 {dimension_numbers = #tpu.dot_dimension_numbers<[1], [0], [0], [1], [0, 0, 1, 1], [], []>} : vector<8x8xbf16>, vector<8x256xbf16>, vector<8x256xf32> -> vector<8x256xf32>
    %c5 = arith.constant 5 : index
    %c0_52 = arith.constant 0 : index
    %c0_53 = arith.constant 0 : index
    %92 = vector.load %arg7[%c5, %c0_52, %c0_53] : memref<9x8x8xbf16, #tpu.memory_space<vmem>>, vector<1x8x8xbf16>
    %93 = vector.shape_cast %92 : vector<1x8x8xbf16> to vector<8x8xbf16>
    %cst_54 = arith.constant dense<0.000000e+00> : vector<8x256xf32>
    %94 = tpu.matmul %93, %28, %cst_54 {dimension_numbers = #tpu.dot_dimension_numbers<[1], [0], [0], [1], [0, 0, 1, 1], [], []>} : vector<8x8xbf16>, vector<8x256xbf16>, vector<8x256xf32> -> vector<8x256xf32>
    %95 = arith.addf %91, %94 : vector<8x256xf32>
    %c8 = arith.constant 8 : index
    %c0_55 = arith.constant 0 : index
    %c0_56 = arith.constant 0 : index
    %96 = vector.load %arg7[%c8, %c0_55, %c0_56] : memref<9x8x8xbf16, #tpu.memory_space<vmem>>, vector<1x8x8xbf16>
    %97 = vector.shape_cast %96 : vector<1x8x8xbf16> to vector<8x8xbf16>
    %cst_57 = arith.constant dense<0.000000e+00> : vector<8x256xf32>
    %98 = tpu.matmul %97, %36, %cst_57 {dimension_numbers = #tpu.dot_dimension_numbers<[1], [0], [0], [1], [0, 0, 1, 1], [], []>} : vector<8x8xbf16>, vector<8x256xbf16>, vector<8x256xf32> -> vector<8x256xf32>
    %99 = arith.addf %95, %98 : vector<8x256xf32>
    %c255_i32 = arith.constant 255 : i32
    %100 = tpu.dynamic_rotate %99 by %c255_i32 dim 1 : vector<8x256xf32>, i32 -> vector<8x256xf32>
    %101 = vector.broadcast %9 : vector<1x256xf32> to vector<8x256xf32>
    %102 = arith.mulf %100, %101 : vector<8x256xf32>
    %103 = arith.addf %88, %102 : vector<8x256xf32>
    %c0_58 = arith.constant 0 : index
    %c0_59 = arith.constant 0 : index
    %104 = vector.load %arg8[%c0_58, %c0_59] : memref<8x1xf32, #tpu.memory_space<vmem>>, vector<8x1xf32>
    %105 = vector.broadcast %104 : vector<8x1xf32> to vector<8x256xf32>
    %106 = arith.addf %103, %105 : vector<8x256xf32>
    %cst_60 = arith.constant 2.000000e+01 : f32
    %107 = vector.broadcast %cst_60 : f32 to vector<8x256xf32>
    %108 = arith.minimumf %106, %107 : vector<8x256xf32>
    %109 = math.exp %108 : vector<8x256xf32>
    %cst_61 = arith.constant 2.000000e+00 : f32
    %110 = vector.broadcast %cst_61 : f32 to vector<8x256xf32>
    %111 = arith.addf %109, %110 : vector<8x256xf32>
    %112 = arith.mulf %109, %111 : vector<8x256xf32>
    %113 = arith.mulf %106, %112 : vector<8x256xf32>
    %cst_62 = arith.constant 2.000000e+00 : f32
    %114 = vector.broadcast %cst_62 : f32 to vector<8x256xf32>
    %115 = arith.addf %112, %114 : vector<8x256xf32>
    %116 = tpu.reciprocal %115 {approx = true} : vector<8x256xf32> -> vector<8x256xf32>
    %117 = arith.mulf %113, %116 : vector<8x256xf32>
    %c0_63 = arith.constant 0 : index
    %c0_64 = arith.constant 0 : index
    %c0_65 = arith.constant 0 : index
    %118 = vector.load %arg2[%c0_63, %c0_64, %c0_65] : memref<1x8x256xbf16, #tpu.memory_space<vmem>>, vector<1x8x256xbf16>
    %119 = vector.shape_cast %118 : vector<1x8x256xbf16> to vector<8x256xbf16>
    %120 = arith.extf %119 : vector<8x256xbf16> to vector<8x256xf32>
    %121 = arith.addf %120, %117 : vector<8x256xf32>
    %122 = arith.truncf %121 : vector<8x256xf32> to vector<8x256xbf16>
    %c0_66 = arith.constant 0 : index
    %c0_67 = arith.constant 0 : index
    %c0_68 = arith.constant 0 : index
    %123 = vector.load %arg9[%c0_66, %c0_67, %c0_68] : memref<1x8x256xbf16, #tpu.memory_space<vmem>>, vector<1x8x256xbf16>
    %124 = vector.shape_cast %123 : vector<1x8x256xbf16> to vector<8x256xbf16>
    %125 = vector.shape_cast %122 : vector<8x256xbf16> to vector<1x8x256xbf16>
    tpu.vector_store %arg9[%c0_66, %c0_67, %c0_68], %125 {strides = array<i32>} : memref<1x8x256xbf16, #tpu.memory_space<vmem>>, vector<1x8x256xbf16>,
    %c1_69 = arith.constant 1 : index
    %c0_70 = arith.constant 0 : index
    %c0_71 = arith.constant 0 : index
    %126 = vector.load %arg7[%c1_69, %c0_70, %c0_71] : memref<9x8x8xbf16, #tpu.memory_space<vmem>>, vector<1x8x8xbf16>
    %127 = vector.shape_cast %126 : vector<1x8x8xbf16> to vector<8x8xbf16>
    %cst_72 = arith.constant dense<0.000000e+00> : vector<8x16xf32>
    %128 = tpu.matmul %127, %58, %cst_72 {dimension_numbers = #tpu.dot_dimension_numbers<[1], [0], [0], [1], [0, 0, 1, 1], [], []>} : vector<8x8xbf16>, vector<8x16xbf16>, vector<8x16xf32> -> vector<8x16xf32>
    %c0_73 = arith.constant 0 : index
    %c0_74 = arith.constant 0 : index
    %c0_75 = arith.constant 0 : index
    %129 = vector.load %arg7[%c0_73, %c0_74, %c0_75] : memref<9x8x8xbf16, #tpu.memory_space<vmem>>, vector<1x8x8xbf16>
    %130 = vector.shape_cast %129 : vector<1x8x8xbf16> to vector<8x8xbf16>
    %cst_76 = arith.constant dense<0.000000e+00> : vector<8x16xf32>
    %131 = tpu.matmul %130, %58, %cst_76 {dimension_numbers = #tpu.dot_dimension_numbers<[1], [0], [0], [1], [0, 0, 1, 1], [], []>} : vector<8x8xbf16>, vector<8x16xbf16>, vector<8x16xf32> -> vector<8x16xf32>
    %c2_77 = arith.constant 2 : index
    %c0_78 = arith.constant 0 : index
    %c0_79 = arith.constant 0 : index
    %132 = vector.load %arg7[%c2_77, %c0_78, %c0_79] : memref<9x8x8xbf16, #tpu.memory_space<vmem>>, vector<1x8x8xbf16>
    %133 = vector.shape_cast %132 : vector<1x8x8xbf16> to vector<8x8xbf16>
    %cst_80 = arith.constant dense<0.000000e+00> : vector<8x16xf32>
    %134 = tpu.matmul %133, %58, %cst_80 {dimension_numbers = #tpu.dot_dimension_numbers<[1], [0], [0], [1], [0, 0, 1, 1], [], []>} : vector<8x8xbf16>, vector<8x16xbf16>, vector<8x16xf32> -> vector<8x16xf32>
    %135 = vector.extract_strided_slice %131 {offsets = [0, 15], sizes = [8, 1], strides = [1, 1]} : vector<8x16xf32> to vector<8x1xf32>
    %136 = vector.extract_strided_slice %131 {offsets = [0, 0], sizes = [8, 15], strides = [1, 1]} : vector<8x16xf32> to vector<8x15xf32>
    %137 = tpu.concatenate %135, %136 in 1 : vector<8x1xf32>, vector<8x15xf32> -> vector<8x16xf32>
    %138 = vector.extract_strided_slice %8 {offsets = [0, 0], sizes = [1, 16], strides = [1, 1]} : vector<1x256xf32> to vector<1x16xf32>
    %139 = vector.broadcast %138 : vector<1x16xf32> to vector<8x16xf32>
    %140 = arith.mulf %137, %139 : vector<8x16xf32>
    %141 = arith.addf %128, %140 : vector<8x16xf32>
    %142 = vector.extract_strided_slice %134 {offsets = [0, 1], sizes = [8, 15], strides = [1, 1]} : vector<8x16xf32> to vector<8x15xf32>
    %143 = vector.extract_strided_slice %134 {offsets = [0, 0], sizes = [8, 1], strides = [1, 1]} : vector<8x16xf32> to vector<8x1xf32>
    %144 = tpu.concatenate %142, %143 in 1 : vector<8x15xf32>, vector<8x1xf32> -> vector<8x16xf32>
    %145 = vector.extract_strided_slice %9 {offsets = [0, 0], sizes = [1, 16], strides = [1, 1]} : vector<1x256xf32> to vector<1x16xf32>
    %146 = vector.broadcast %145 : vector<1x16xf32> to vector<8x16xf32>
    %147 = arith.mulf %144, %146 : vector<8x16xf32>
    %148 = arith.addf %141, %147 : vector<8x16xf32>
    %c7_81 = arith.constant 7 : index
    %c0_82 = arith.constant 0 : index
    %c0_83 = arith.constant 0 : index
    %149 = vector.load %arg7[%c7_81, %c0_82, %c0_83] : memref<9x8x8xbf16, #tpu.memory_space<vmem>>, vector<1x8x8xbf16>
    %150 = vector.shape_cast %149 : vector<1x8x8xbf16> to vector<8x8xbf16>
    %cst_84 = arith.constant dense<0.000000e+00> : vector<8x16xf32>
    %151 = tpu.matmul %150, %62, %cst_84 {dimension_numbers = #tpu.dot_dimension_numbers<[1], [0], [0], [1], [0, 0, 1, 1], [], []>} : vector<8x8xbf16>, vector<8x16xbf16>, vector<8x16xf32> -> vector<8x16xf32>
    %c6_85 = arith.constant 6 : index
    %c0_86 = arith.constant 0 : index
    %c0_87 = arith.constant 0 : index
    %152 = vector.load %arg7[%c6_85, %c0_86, %c0_87] : memref<9x8x8xbf16, #tpu.memory_space<vmem>>, vector<1x8x8xbf16>
    %153 = vector.shape_cast %152 : vector<1x8x8xbf16> to vector<8x8xbf16>
    %cst_88 = arith.constant dense<0.000000e+00> : vector<8x16xf32>
    %154 = tpu.matmul %153, %62, %cst_88 {dimension_numbers = #tpu.dot_dimension_numbers<[1], [0], [0], [1], [0, 0, 1, 1], [], []>} : vector<8x8xbf16>, vector<8x16xbf16>, vector<8x16xf32> -> vector<8x16xf32>
    %c8_89 = arith.constant 8 : index
    %c0_90 = arith.constant 0 : index
    %c0_91 = arith.constant 0 : index
    %155 = vector.load %arg7[%c8_89, %c0_90, %c0_91] : memref<9x8x8xbf16, #tpu.memory_space<vmem>>, vector<1x8x8xbf16>
    %156 = vector.shape_cast %155 : vector<1x8x8xbf16> to vector<8x8xbf16>
    %cst_92 = arith.constant dense<0.000000e+00> : vector<8x16xf32>
    %157 = tpu.matmul %156, %62, %cst_92 {dimension_numbers = #tpu.dot_dimension_numbers<[1], [0], [0], [1], [0, 0, 1, 1], [], []>} : vector<8x8xbf16>, vector<8x16xbf16>, vector<8x16xf32> -> vector<8x16xf32>
    %158 = vector.extract_strided_slice %154 {offsets = [0, 15], sizes = [8, 1], strides = [1, 1]} : vector<8x16xf32> to vector<8x1xf32>
    %159 = vector.extract_strided_slice %154 {offsets = [0, 0], sizes = [8, 15], strides = [1, 1]} : vector<8x16xf32> to vector<8x15xf32>
    %160 = tpu.concatenate %158, %159 in 1 : vector<8x1xf32>, vector<8x15xf32> -> vector<8x16xf32>
    %161 = vector.extract_strided_slice %8 {offsets = [0, 0], sizes = [1, 16], strides = [1, 1]} : vector<1x256xf32> to vector<1x16xf32>
    %162 = vector.broadcast %161 : vector<1x16xf32> to vector<8x16xf32>
    %163 = arith.mulf %160, %162 : vector<8x16xf32>
    %164 = arith.addf %151, %163 : vector<8x16xf32>
    %165 = vector.extract_strided_slice %157 {offsets = [0, 1], sizes = [8, 15], strides = [1, 1]} : vector<8x16xf32> to vector<8x15xf32>
    %166 = vector.extract_strided_slice %157 {offsets = [0, 0], sizes = [8, 1], strides = [1, 1]} : vector<8x16xf32> to vector<8x1xf32>
    %167 = tpu.concatenate %165, %166 in 1 : vector<8x15xf32>, vector<8x1xf32> -> vector<8x16xf32>
    %168 = vector.extract_strided_slice %9 {offsets = [0, 0], sizes = [1, 16], strides = [1, 1]} : vector<1x256xf32> to vector<1x16xf32>
    %169 = vector.broadcast %168 : vector<1x16xf32> to vector<8x16xf32>
    %170 = arith.mulf %167, %169 : vector<8x16xf32>
    %171 = arith.addf %164, %170 : vector<8x16xf32>
    %172 = vector.extract_strided_slice %103 {offsets = [0, 0], sizes = [8, 16], strides = [1, 1]} : vector<8x256xf32> to vector<8x16xf32>
    %173 = arith.addf %172, %148 : vector<8x16xf32>
    %c0_93 = arith.constant 0 : index
    %c0_94 = arith.constant 0 : index
    %174 = vector.load %arg8[%c0_93, %c0_94] : memref<8x1xf32, #tpu.memory_space<vmem>>, vector<8x1xf32>
    %175 = vector.broadcast %174 : vector<8x1xf32> to vector<8x16xf32>
    %176 = arith.addf %173, %175 : vector<8x16xf32>
    %cst_95 = arith.constant 2.000000e+01 : f32
    %177 = vector.broadcast %cst_95 : f32 to vector<8x16xf32>
    %178 = arith.minimumf %176, %177 : vector<8x16xf32>
    %179 = math.exp %178 : vector<8x16xf32>
    %cst_96 = arith.constant 2.000000e+00 : f32
    %180 = vector.broadcast %cst_96 : f32 to vector<8x16xf32>
    %181 = arith.addf %179, %180 : vector<8x16xf32>
    %182 = arith.mulf %179, %181 : vector<8x16xf32>
    %183 = arith.mulf %176, %182 : vector<8x16xf32>
    %cst_97 = arith.constant 2.000000e+00 : f32
    %184 = vector.broadcast %cst_97 : f32 to vector<8x16xf32>
    %185 = arith.addf %182, %184 : vector<8x16xf32>
    %186 = tpu.reciprocal %185 {approx = true} : vector<8x16xf32> -> vector<8x16xf32>
    %187 = arith.mulf %183, %186 : vector<8x16xf32>
    %c0_98 = arith.constant 0 : index
    %c0_99 = arith.constant 0 : index
    %c0_100 = arith.constant 0 : index
    %188 = vector.load %arg2[%c0_98, %c0_99, %c0_100] : memref<1x8x256xbf16, #tpu.memory_space<vmem>>, vector<1x8x16xbf16>
    %189 = vector.shape_cast %188 : vector<1x8x16xbf16> to vector<8x16xbf16>
    %190 = arith.extf %189 : vector<8x16xbf16> to vector<8x16xf32>
    %191 = arith.addf %190, %187 : vector<8x16xf32>
    %192 = arith.truncf %191 : vector<8x16xf32> to vector<8x16xbf16>
    %c0_101 = arith.constant 0 : index
    %c0_102 = arith.constant 0 : index
    %c0_103 = arith.constant 0 : index
    %193 = vector.load %arg9[%c0_101, %c0_102, %c0_103] : memref<1x8x256xbf16, #tpu.memory_space<vmem>>, vector<1x8x16xbf16>
    %194 = vector.shape_cast %193 : vector<1x8x16xbf16> to vector<8x16xbf16>
    %195 = vector.shape_cast %192 : vector<8x16xbf16> to vector<1x8x16xbf16>
    tpu.vector_store %arg9[%c0_101, %c0_102, %c0_103], %195 {strides = array<i32>} : memref<1x8x256xbf16, #tpu.memory_space<vmem>>, vector<1x8x16xbf16>,
    %196 = vector.extract_strided_slice %103 {offsets = [0, 240], sizes = [8, 16], strides = [1, 1]} : vector<8x256xf32> to vector<8x16xf32>
    %197 = arith.addf %196, %171 : vector<8x16xf32>
    %c0_104 = arith.constant 0 : index
    %c0_105 = arith.constant 0 : index
    %198 = vector.load %arg8[%c0_104, %c0_105] : memref<8x1xf32, #tpu.memory_space<vmem>>, vector<8x1xf32>
    %199 = vector.broadcast %198 : vector<8x1xf32> to vector<8x16xf32>
    %200 = arith.addf %197, %199 : vector<8x16xf32>
    %cst_106 = arith.constant 2.000000e+01 : f32
    %201 = vector.broadcast %cst_106 : f32 to vector<8x16xf32>
    %202 = arith.minimumf %200, %201 : vector<8x16xf32>
    %203 = math.exp %202 : vector<8x16xf32>
    %cst_107 = arith.constant 2.000000e+00 : f32
    %204 = vector.broadcast %cst_107 : f32 to vector<8x16xf32>
    %205 = arith.addf %203, %204 : vector<8x16xf32>
    %206 = arith.mulf %203, %205 : vector<8x16xf32>
    %207 = arith.mulf %200, %206 : vector<8x16xf32>
    %cst_108 = arith.constant 2.000000e+00 : f32
    %208 = vector.broadcast %cst_108 : f32 to vector<8x16xf32>
    %209 = arith.addf %206, %208 : vector<8x16xf32>
    %210 = tpu.reciprocal %209 {approx = true} : vector<8x16xf32> -> vector<8x16xf32>
    %211 = arith.mulf %207, %210 : vector<8x16xf32>
    %c0_109 = arith.constant 0 : index
    %c0_110 = arith.constant 0 : index
    %c240 = arith.constant 240 : index
    %212 = vector.load %arg2[%c0_109, %c0_110, %c240] : memref<1x8x256xbf16, #tpu.memory_space<vmem>>, vector<1x8x16xbf16>
    %213 = vector.shape_cast %212 : vector<1x8x16xbf16> to vector<8x16xbf16>
    %214 = arith.extf %213 : vector<8x16xbf16> to vector<8x16xf32>
    %215 = arith.addf %214, %211 : vector<8x16xf32>
    %216 = arith.truncf %215 : vector<8x16xf32> to vector<8x16xbf16>
    %c0_111 = arith.constant 0 : index
    %c0_112 = arith.constant 0 : index
    %c240_113 = arith.constant 240 : index
    %217 = vector.load %arg9[%c0_111, %c0_112, %c240_113] : memref<1x8x256xbf16, #tpu.memory_space<vmem>>, vector<1x8x16xbf16>
    %218 = vector.shape_cast %217 : vector<1x8x16xbf16> to vector<8x16xbf16>
    %219 = vector.shape_cast %216 : vector<8x16xbf16> to vector<1x8x16xbf16>
    tpu.vector_store %arg9[%c0_111, %c0_112, %c240_113], %219 {strides = array<i32>} : memref<1x8x256xbf16, #tpu.memory_space<vmem>>, vector<1x8x16xbf16>,
    return
  }
  func.func @transform_0(%arg0: i32, %arg1: i32) -> (i32, i32, i32) {
    %c0_i32 = arith.constant 0 : i32
    %c0_i32_0 = arith.constant 0 : i32
    return %arg0, %c0_i32, %arg1 : i32, i32, i32
  }
  func.func @transform_1(%arg0: i32, %arg1: i32) -> (i32, i32, i32, i32) {
    %c0_i32 = arith.constant 0 : i32
    %c0_i32_0 = arith.constant 0 : i32
    %c0_i32_1 = arith.constant 0 : i32
    return %arg0, %arg1, %c0_i32, %c0_i32_0 : i32, i32, i32, i32
  }
  func.func @transform_2(%arg0: i32, %arg1: i32) -> (i32, i32) {
    %c0_i32 = arith.constant 0 : i32
    %c0_i32_0 = arith.constant 0 : i32
    %c0_i32_1 = arith.constant 0 : i32
    return %c0_i32, %c0_i32_0 : i32, i32
  }
  func.func @transform_3(%arg0: i32, %arg1: i32) -> (i32, i32) {
    %c0_i32 = arith.constant 0 : i32
    %c0_i32_0 = arith.constant 0 : i32
    %c0_i32_1 = arith.constant 0 : i32
    return %c0_i32, %c0_i32_0 : i32, i32
  }
  func.func @transform_4(%arg0: i32, %arg1: i32) -> (i32, i32) {
    %c0_i32 = arith.constant 0 : i32
    %c0_i32_0 = arith.constant 0 : i32
    %c0_i32_1 = arith.constant 0 : i32
    return %c0_i32, %c0_i32_0 : i32, i32
  }
  func.func @transform_5(%arg0: i32, %arg1: i32) -> (i32, i32, i32) {
    %c0_i32 = arith.constant 0 : i32
    %c0_i32_0 = arith.constant 0 : i32
    %c0_i32_1 = arith.constant 0 : i32
    %c0_i32_2 = arith.constant 0 : i32
    return %c0_i32, %c0_i32_0, %c0_i32_1 : i32, i32, i32
  }
  func.func @transform_6(%arg0: i32, %arg1: i32) -> (i32, i32) {
    %c0_i32 = arith.constant 0 : i32
    %c0_i32_0 = arith.constant 0 : i32
    %c0_i32_1 = arith.constant 0 : i32
    return %c0_i32, %c0_i32_0 : i32, i32
  }
  func.func @transform_7(%arg0: i32, %arg1: i32) -> (i32, i32, i32) {
    %c0_i32 = arith.constant 0 : i32
    %c0_i32_0 = arith.constant 0 : i32
    return %arg0, %c0_i32, %arg1 : i32, i32, i32
  }
}

</mosaic_0001>

<bundles_post_ra>
// kernel: tile.27
= control target key start
LH: loop header
LB: loop body
LE: loop exit
PB: predicated region body
PF: predicated region fallthrough
CT: control target
= control target key end

     0   :  { %s39_s0 = inlined_call_operand.vmem [shape: pred[16], index: 0, kind: input, shape index: {}]   ;;  %s40_s1 = inlined_call_operand.vmem [shape: pred[16,16], index: 1, kind: output, shape index: {}]  }
   0x1   :  { %v4_v0 = vld [vmem:[%s39_s0] ss:$0 sm:$0xff] }
   0x2   :  { %v7_v1 = vand.u32 255, %v4_v0 }
   0x4   :  { %v8_v2 = vpack.c.b16 0, %v7_v1 }
   0x6   :  { %v9_v3 = vpack.c.b8 0, %v8_v2 }
   0x8   :  { %12 = vst [vmem:[%s40_s1] sm:$0x3] %v9_v3 }
   0x9   :  { %19 = vst [vmem:[%s40_s1 + $0x2] sm:$0x3] %v9_v3 }

// kernel: tile.29
= control target key start
LH: loop header
LB: loop body
LE: loop exit
PB: predicated region body
PF: predicated region fallthrough
CT: control target
= control target key end

     0   :  { %s51_s8 = smov 3  ;;  %s65_s9 = smov 3  ;;  %vm34_vm0 = vcmask 130048   ;;  %vm41_vm1 = vcmask 1048448   ;;  %vm48_vm2 = vcmask 917248   ;;  %vm55_vm3 = vcmask 786048   ;;  %s136_s0 = inlined_call_operand.vmem [shape: pred[16,16], index: 0, kind: input, shape index: {}]   ;;  %s137_s1 = inlined_call_operand.vmem [shape: pred[1,256], index: 1, kind: output, shape index: {}]  }
   0x1   :  { %v101_v0 = vld [vmem:[%s136_s0] sm:$0xf]   ;;  %s37_s0 = smov 3  ;;  %s110_s10 = smov 112   ;;  %vm62_vm4 = vcmask 654848   ;;  %vm69_vm5 = vcmask 523648  }
   0x2   :  { %v13_v1 = vunpack.c.1.s8 %v101_v0  ;;  %v27_v2 = vunpack.c.0.s8 %v101_v0  ;;  %s111_s11 = smov 80   ;;  %s44_s12 = smov 3  ;;  %vm76_vm6 = vcmask 392448   ;;  %vm83_vm7 = vcmask 261248  }
   0x3   :  { %s58_s13 = smov 3  ;;  %s112_s14 = smov 48  }
   0x4   :  { %18 = vst [vmem:[#allocation1 + $0x8] sm:$0xff] %v13_v1  ;;  %s72_s15 = smov 3  ;;  %s113_s16 = smov 96  }
   0x5   :  { %31 = vst [vmem:[#allocation1] sm:$0xff] %v27_v2  ;;  %s114_s17 = smov 64   ;;  %s79_s18 = smov 3 }
   0x6   :  { %s115_s19 = smov 32   ;;  %s116_s20 = smov 16  }
   0x7   :  { %s32_s21 = smov 3 }
   0xc   :  { %v38_v3 = vld [vmem:[#allocation1 + $0x7] ss:$8 sm:%s37_s0]   ;;  %v52_v4 = vld [vmem:[#allocation1 + $0x5] ss:$8 sm:%s51_s8]   ;;  %v66_v5 = vld [vmem:[#allocation1 + $0x3] ss:$8 sm:%s65_s9]  }
   0xd   :  { %39 = vrot.lane.b32.xlu0 %v38_v3, %s110_s10  ;;  %53 = vrot.lane.b32.xlu1 %v52_v4, %s111_s11  ;;  %v45_v6 = vld [vmem:[#allocation1 + $0x6] ss:$8 sm:%s44_s12]   ;;  %v59_v7 = vld [vmem:[#allocation1 + $0x4] ss:$8 sm:%s58_s13]  }
   0xe   :  { %67 = vrot.lane.b32.xlu2 %v66_v5, %s112_s14  ;;  %v73_v8 = vld [vmem:[#allocation1 + $0x2] ss:$8 sm:%s72_s15]   ;;  %v80_v9 = vld [vmem:[#allocation1 + $0x1] ss:$8 sm:%s79_s18]   ;;  %v33_v10 = vld [vmem:[#allocation1] ss:$8 sm:%s32_s21]  }
   0xf   :  { %35 = vst.msk [vmem:[#allocation0] ss:$8 sm:$0x3] %vm34_vm0, %v33_v10  }
  0x15   :  { %46 = vrot.lane.b32.xlu0 %v45_v6, %s113_s16  ;;  %60 = vrot.lane.b32.xlu1 %v59_v7, %s114_s17 }
  0x16   :  { %74 = vrot.lane.b32.xlu2 %v73_v8, %s115_s19 }
  0x1d   :  { %81 = vrot.lane.b32.xlu0 %v80_v9, %s116_s20 }
  0x68   :  { %v68_v11 = vpop.permute.xlu2 %67  }
  0x70   :  { %v75_v12 = vpop.permute.xlu2 %74  }
  0x7f   :  { %v40_v13 = vpop.permute.xlu0 %39   ;;  %v54_v14 = vpop.permute.xlu1 %53  }
  0x80   :  { %42 = vst.msk [vmem:[#allocation0] ss:$8 sm:$0x3] %vm41_vm1, %v40_v13  }
  0x87   :  { %v47_v15 = vpop.permute.xlu0 %46   ;;  %v61_v16 = vpop.permute.xlu1 %60  }
  0x88   :  { %49 = vst.msk [vmem:[#allocation0] ss:$8 sm:$0x3] %vm48_vm2, %v47_v15  }
  0x89   :  { %56 = vst.msk [vmem:[#allocation0] ss:$8 sm:$0x3] %vm55_vm3, %v54_v14  }
  0x8a   :  { %63 = vst.msk [vmem:[#allocation0] ss:$8 sm:$0x3] %vm62_vm4, %v61_v16  }
  0x8b   :  { %70 = vst.msk [vmem:[#allocation0] ss:$8 sm:$0x3] %vm69_vm5, %v68_v11  }
  0x8c   :  { %77 = vst.msk [vmem:[#allocation0] ss:$8 sm:$0x3] %vm76_vm6, %v75_v12  }
  0x8f   :  { %v82_v17 = vpop.permute.xlu0 %81  }
  0x90   :  { %84 = vst.msk [vmem:[#allocation0] ss:$8 sm:$0x3] %vm83_vm7, %v82_v17  }
  0x97   :  { %v87_v18 = vld [vmem:[#allocation0] sm:$0xf]  ;;  %v94_v19 = vld [vmem:[#allocation0 + $0x8] sm:$0xf] }
  0x98   :  { %v90_v20 = vpack.c.b16 0, %v87_v18  ;;  %v98_v21 = vpack.c.b16 0, %v94_v19 }
  0x9a   :  { %v91_v22 = vpack.c.b8 0, %v90_v20  ;;  %v99_v23 = vpack.c.b8 0, %v98_v21 }
  0x9c   :  { %92 = vst [vmem:[%s137_s1] sm:$0x1] %v91_v22 }
  0x9d   :  { %102 = vst [vmem:[%s137_s1 + $0x1] sm:$0x1] %v99_v23 }

// kernel: csp_block_forward.3
= control target key start
LH: loop header
LB: loop body
LE: loop exit
PB: predicated region body
PF: predicated region fallthrough
CT: control target
= control target key end

     0   :  { %s459_s12 = smov 0   ;;  %s461_s13 = smov 0   ;;  %s502_s0 = inlined_call_operand.vmem [shape: bf16[2,4,256], index: 0, kind: input, shape index: {}]   ;;  %s503_s1 = inlined_call_operand.vmem [shape: bf16[8,4], index: 1, kind: input, shape index: {}]   ;;  %s504_s2 = inlined_call_operand.vmem [shape: f32[8,1], index: 2, kind: input, shape index: {}]   ;;  %s505_s3 = inlined_call_operand.vmem [shape: bf16[2,8,256], index: 3, kind: output, shape index: {}]  }
   0x1   :  { %s463_s14 = smov 0  }
   0x2 LB: > { %s25_s15 = sadd.s32 1, %s432_s13  ;;  %p369_p0 = scmp.ge.s32.totalorder %s436_s14, 1  ;;  %s436_s14 = sphi %s463_s14, %s13_s14   ;;  %s432_s13 = sphi %s461_s13, %s507_s13   ;;  %s428_s12 = sphi %s459_s12, %s506_s12  }
   0x3   : > { %p27_p1 = scmp.ge.s32.totalorder %s25_s15, 2  ;;  %p158_p2 = scmp.lt.s32.totalorder %s436_s14, 3 }
   0x5   : > { %s509_s15 = smov (%p27_p1, %s25_s15), 0  ;;  %p159_p3 = pnand %p369_p0, %p158_p2 }
   0x6   : > { %p191_p4 = scmp.lt.s32.totalorder (!%p159_p3), %s428_s12, 1 }
   0x7   : > { %162 = sbr.rel (%p159_p3) target bundleno = 186 (0xba), region = 32 }
   0xc   : > { %v438_v0 = vmov 0   ;;  %v213_v1 = vld [vmem:[%s504_s2] sm:$0xff]  ;;  %s511_s12 = smov (!%p191_p4, %s428_s12), 1  ;;  %vm227_vm0 = vcmask 1041408   ;;  %vm223_vm1 = vcmask 31744  }
   0xd   : > { %405 = vset.pattern.permute.xlu0 %v438_v0  ;;  %s378_s18 = sshll.u32 %s511_s12, 2  ;;  %v211_v7 = vld [vmem:[%s503_s1] sm:$0xf]  ;;  %s379_s24 = sshll.u32 %s511_s12, 3 }
   0xe   : > { %216 = vperm.xlu0 %405, %v213_v1   ;;  %s198_s21 = scalar_lea.vmem %s502_s0, %s378_s18  ;;  %s208_s27 = scalar_lea.vmem %s505_s3, %s379_s24 }
   0xf   : > { %v212_v2 = vld [vmem:[%s198_s21] sm:$0xf] }
  0x10   : > { %220 = vst [vmem:[#allocation1] ss:$4 sm:$0xff] %v212_v2 }
  0x17   : > { %v221_v3 = vld.sshfl [vmem:[#allocation1] sm:$0xff pattern:$0x73625140]  ;;  %v222_v4 = vld.sshfl [vmem:[#allocation1 + $0x8] sm:$0xff pattern:$0x73625140] }
  0x18   : > { %v228_v5 = vsel %vm227_vm0, %v221_v3, 0  ;;  %v230_v6 = vsel %vm227_vm0, %v222_v4, 0 }
  0x19   : > { %239 = vmatpush.bf16.msra.mxu0 %v228_v5  ;;  %252 = vmatpush.bf16.msra.mxu1 %v230_v6 }
  0x1c   : > { %374 = vmatmul.msk.bf16.vlgmr.msra.gmra.mxu0 %vm223_vm1, %v211_v7  ;;  %375 = vmatmul.msk.bf16.vlgmr.msra.gmra.mxu1 %vm223_vm1, %v211_v7 }
  0x80   : > { %v217_v8 = vpop.permute.xlu0 %216 }
  0x99   : > { %v241_v9 = vpop.f32.mrf.mxu0  ;;  %v254_v10 = vpop.f32.mrf.mxu1 }
  0x9a   : > { %v242_v11 = vadd.f32 %v241_v9, %v217_v8  ;;  %v255_v12 = vadd.f32 %v254_v10, %v217_v8 }
  0x9c   : > { %v258_v13 = vmin.f32 %v242_v11, 20.0  ;;  %v259_v14 = vmin.f32 %v255_v12, 20.0 }
  0x9e   : > { %v260_v15 = vmul.f32 1.442695, %v258_v13  ;;  %v262_v16 = vmul.f32 1.442695, %v259_v14 }
  0xa0   : > { %406 = vpow2.f32 %v260_v15 }
  0xa1   : > { %408 = vpow2.f32 %v262_v16  ;;  %v243_v17 = vpop.f32.mrf.mxu0  ;;  %v256_v18 = vpop.f32.mrf.mxu1 }
  0xa6   : > { %v407_v19 = vpop.eup %406 }
  0xa7   : > { %v409_v20 = vpop.eup %408  ;;  %v264_v21 = vadd.f32 2.0, %v407_v19 }
  0xa8   : > { %v265_v22 = vadd.f32 2.0, %v409_v20 }
  0xa9   : > { %v266_v23 = vmul.f32 %v407_v19, %v264_v21 }
  0xaa   : > { %v267_v24 = vmul.f32 %v409_v20, %v265_v22 }
  0xab   : > { %v270_v25 = vadd.f32 2.0, %v266_v23  ;;  %v268_v27 = vmul.f32 %v266_v23, %v242_v11 }
  0xac   : > { %v271_v26 = vadd.f32 2.0, %v267_v24  ;;  %v269_v29 = vmul.f32 %v267_v24, %v255_v12 }
  0xad   : > { %410 = vrcp.f32 %v270_v25 }
  0xae   : > { %412 = vrcp.f32 %v271_v26 }
  0xb3   : > { %v411_v28 = vpop.eup %410 }
  0xb4   : > { %v413_v30 = vpop.eup %412  ;;  %v274_v31 = vmul.f32 %v411_v28, %v268_v27 }
  0xb5   : > { %v275_v32 = vmul.f32 %v413_v30, %v269_v29 }
  0xb7   : > { %v276_v33 = vpack.c.bf16 %v275_v32, %v274_v31 }
  0xb9   : > { %277 = vst [vmem:[%s208_s27] sm:$0xff] %v276_v33 }
  0xba PF: > { %s13_s14 = sadd.s32 1, %s436_s14   ;;  %s506_s12 = smov %s432_s13 }
  0xbb   : > { %p10_p5 = scmp.ge.s32.totalorder %s13_s14, 4   ;;  %s507_s13 = smov %s509_s15 }
  0xbd   :  { %12 = sbr.rel (!%p10_p5) target bundleno = 2 (0x2), region = 62 }

// kernel: csp_block_forward.4
= control target key start
LH: loop header
LB: loop body
LE: loop exit
PB: predicated region body
PF: predicated region fallthrough
CT: control target
= control target key end

     0   :  { %s1355_s24 = smov 0   ;;  %s1357_s25 = smov 0   ;;  %s1537_s0 = inlined_call_operand.vmem [shape: bf16[2,8,256], index: 0, kind: input, shape index: {}]   ;;  %s1538_s1 = inlined_call_operand.vmem [shape: bf16[2,1,8,32], index: 1, kind: input, shape index: {}]   ;;  %s1539_s2 = inlined_call_operand.vmem [shape: f32[4,256], index: 2, kind: input, shape index: {}]   ;;  %s1540_s3 = inlined_call_operand.vmem [shape: bf16[8,8], index: 3, kind: input, shape index: {}]   ;;  %s1541_s4 = inlined_call_operand.vmem [shape: f32[8,1], index: 4, kind: input, shape index: {}]   ;;  %s1542_s5 = inlined_call_operand.vmem [shape: bf16[9,8,8], index: 5, kind: input, shape index: {}]   ;;  %s1543_s6 = inlined_call_operand.vmem [shape: f32[8,1], index: 6, kind: input, shape index: {}]   ;;  %s1544_s7 = inlined_call_operand.vmem [shape: bf16[2,8,256], index: 7, kind: output, shape index: {}]  }
   0x1   :  { %s1359_s26 = smov 0  }
   0x2 LB: > { %s29_s27 = sadd.s32 1, %s1302_s25  ;;  %p1169_p0 = scmp.ge.s32.totalorder %s1306_s26, 1  ;;  %s1306_s26 = sphi %s1359_s26, %s17_s26   ;;  %s1302_s25 = sphi %s1357_s25, %s1546_s25   ;;  %s1298_s24 = sphi %s1355_s24, %s1545_s24  }
   0x3   : > { %p31_p1 = scmp.ge.s32.totalorder %s29_s27, 2  ;;  %p272_p2 = scmp.lt.s32.totalorder %s1306_s26, 3 }
   0x5   : > { %s1548_s27 = smov (%p31_p1, %s29_s27), 0  ;;  %p273_p3 = pnand %p1169_p0, %p272_p2 }
   0x6   : > { %p320_p4 = scmp.lt.s32.totalorder (!%p273_p3), %s1298_s24, 1  ;;  %s1309_s17 = smov (!%p273_p3), 16  }
   0x7   : > { %276 = sbr.rel (%p273_p3) target bundleno = 786 (0x312), region = 48  ;;  %s1310_s18 = smov (!%p273_p3), 112  }
   0x8   : > { %s1311_s21 = smov (!%p273_p3), 1   ;;  %s1312_s22 = smov (!%p273_p3), 113  }
   0x9   : > { %s1313_s23 = smov (!%p273_p3), 15   ;;  %s1314_s28 = smov (!%p273_p3), 127  }
   0xc   : > { %v1308_v0 = vmov 0   ;;  %v362_v1 = vld [vmem:[%s1541_s4] sm:$0xff]  ;;  %s1550_s24 = smov (!%p320_p4, %s1298_s24), 1  ;;  %vm377_vm0 = vcmask 1043456   ;;  %vm373_vm1 = vcmask 64512   ;;  %v434_v56 = vlaneseq }
   0xd   : > { %1253 = vset.pattern.permute.xlu0 %v1308_v0  ;;  %1254 = vset.pattern.permute.xlu1 %v1308_v0  ;;  %s1220_s30 = sshll.u32 %s1550_s24, 3  ;;  %s1172_s8 = sshll.u32 %s1550_s24, 2  ;;  %v360_v7 = vld [vmem:[%s1540_s3] sm:$0xf]  ;;  %v1182_v55 = vld [vmem:[%s1542_s5 + $0x10] sm:$0xf] }
   0xe   : > { %365 = vperm.xlu0 %1253, %v362_v1   ;;  %1255 = vset.pattern.permute.xlu2 %v1308_v0  ;;  %s1385_s11 = scalar_lea.vmem %s1537_s0, %s1220_s30  ;;  %s335_s14 = scalar_lea.vmem %s1538_s1, %s1172_s8  ;;  %v1417_v57 = vand.u32 127, %v434_v56  ;;  %v353_v58 = vld [vmem:[%s1539_s2] ss:$4 sm:$0x3]  ;;  %v1212_v56 = vld [vmem:[%s1542_s5 + $0x1c] sm:$0xf] }
   0xf   : > { %v464_v2 = vld [vmem:[%s335_s14] sm:$0xf]  ;;  %v440_v59 = vperm.slane %v353_v58, 0  ;;  %v441_v60 = vperm.slane %v353_v58, 1  ;;  %vm907_vm4 = vcmask 7168   ;;  %vm933_vm5 = vcmask 121856   ;;  %s344_s14 = scalar_lea.vmem %s1544_s7, %s1220_s30 }
  0x10   : > { %v1391_v3 = vld [vmem:[%s1385_s11] sm:$0xff]  ;;  %v466_v4 = vsel %vm377_vm0, %v464_v2, 0  ;;  %vm436_vm2 = vcmp.lt.s32.totalorder %v1417_v57, 16  ;;  %vm452_vm3 = vcmp.lt.s32.totalorder %v1417_v57, 112  ;;  %vm707_vm6 = vcmp.lt.s32.totalorder %v1417_v57, 1 }
  0x11   : > { %v369_v5 = vunpack.c.l.b16 %v1391_v3  ;;  %v370_v6 = vunpack.c.h.b16 %v1391_v3  ;;  %475 = vmatpush.bf16.msra.mxu2 %v466_v4  ;;  %v1175_v4 = vld [vmem:[%s1539_s2 + $0x1] ss:$4 sm:$0x3]  ;;  %vm818_vm7 = vcmp.lt.s32.totalorder %v1417_v57, 127  ;;  %vm1034_vm8 = vcmask 125952  }
  0x12   : > { %vm1061_vm9 = vcmask 1044352  }
  0x13   : > { %v371_v8 = vpack.c.b16 %v369_v5, %v369_v5  ;;  %v372_v9 = vpack.c.b16 %v370_v6, %v370_v6 }
  0x14   : > { %1180 = vmatmul.msk.bf16.vlgmr.msra.gmra.mxu2 %vm373_vm1, %v360_v7 }
  0x15   : > { %v379_v10 = vsel %vm377_vm0, %v371_v8, 0  ;;  %v382_v11 = vsel %vm377_vm0, %v372_v9, 0  ;;  %v456_v9 = vperm.slane %v1175_v4, 0 }
  0x16   : > { %391 = vmatpush.bf16.msra.mxu0 %v379_v10  ;;  %404 = vmatpush.bf16.msra.mxu1 %v382_v11  ;;  %v457_v10 = vperm.slane %v1175_v4, 1  ;;  %v1181_v11 = vld [vmem:[%s1542_s5 + $0x4] sm:$0xf] }
  0x19   : > { %1178 = vmatmul.msk.bf16.vlgmr.msra.gmra.mxu0 %vm373_vm1, %v360_v7  ;;  %1179 = vmatmul.msk.bf16.vlgmr.msra.gmra.mxu1 %vm373_vm1, %v360_v7 }
  0x80   : > { %v366_v12 = vpop.permute.xlu0 %365 }
  0x96   : > { %v393_v13 = vpop.f32.mrf.mxu0  ;;  %v406_v14 = vpop.f32.mrf.mxu1 }
  0x97   : > { %v394_v15 = vadd.f32 %v393_v13, %v366_v12  ;;  %v407_v16 = vadd.f32 %v406_v14, %v366_v12  ;;  %v477_v17 = vpop.f32.mrf.mxu2 }
  0x98   : > { %v478_v20 = vadd.f32 %v477_v17, %v366_v12 }
  0x99   : > { %v410_v18 = vmin.f32 %v394_v15, 20.0  ;;  %v411_v19 = vmin.f32 %v407_v16, 20.0 }
  0x9a   : > { %v481_v23 = vmin.f32 %v478_v20, 20.0 }
  0x9b   : > { %v412_v21 = vmul.f32 1.442695, %v410_v18  ;;  %v414_v22 = vmul.f32 1.442695, %v411_v19 }
  0x9c   : > { %v482_v24 = vmul.f32 1.442695, %v481_v23  ;;  %v1190_v23 = vld [vmem:[%s1542_s5 + $0xc] sm:$0xf] }
  0x9d   : > { %1256 = vpow2.f32 %v412_v21 }
  0x9e   : > { %1258 = vpow2.f32 %v414_v22  ;;  %v395_v25 = vpop.f32.mrf.mxu0  ;;  %v408_v26 = vpop.f32.mrf.mxu1  ;;  %v1187_v22 = vld [vmem:[%s1542_s5 + $0x1c] sm:$0xf] }
  0x9f   : > { %1260 = vpow2.f32 %v482_v24  ;;  %v479_v27 = vpop.f32.mrf.mxu2  ;;  %v609_v24 = vld [vmem:[%s1542_s5] sm:$0xf]  ;;  %v1195_v25 = vld [vmem:[%s1542_s5 + $0x18] sm:$0xf] }
  0xa3   : > { %v1257_v28 = vpop.eup %1256 }
  0xa4   : > { %v1259_v29 = vpop.eup %1258  ;;  %v416_v30 = vadd.f32 2.0, %v1257_v28 }
  0xa5   : > { %v1261_v31 = vpop.eup %1260  ;;  %v417_v32 = vadd.f32 2.0, %v1259_v29 }
  0xa6   : > { %v418_v33 = vmul.f32 %v1257_v28, %v416_v30  ;;  %v484_v34 = vadd.f32 2.0, %v1261_v31  ;;  %v1199_v28 = vld [vmem:[%s1542_s5 + $0x14] sm:$0xf]  ;;  %v1198_v30 = vld [vmem:[%s1542_s5 + $0x8] sm:$0xf] }
  0xa7   : > { %v419_v35 = vmul.f32 %v1259_v29, %v417_v32  ;;  %v863_v32 = vld [vmem:[%s1542_s5] sm:$0xf] }
  0xa8   : > { %v422_v36 = vadd.f32 2.0, %v418_v33  ;;  %v485_v37 = vmul.f32 %v1261_v31, %v484_v34  ;;  %v420_v40 = vmul.f32 %v418_v33, %v394_v15  ;;  %v1204_v31 = vld [vmem:[%s1542_s5 + $0x20] sm:$0xf]  ;;  %v1209_v33 = vld [vmem:[%s1542_s5 + $0x8] sm:$0xf] }
  0xa9   : > { %v423_v38 = vadd.f32 2.0, %v419_v35  ;;  %v421_v42 = vmul.f32 %v419_v35, %v407_v16  ;;  %v1213_v34 = vld [vmem:[%s1542_s5 + $0x18] sm:$0xf]  ;;  %v1215_v35 = vld [vmem:[%s1542_s5 + $0x20] sm:$0xf] }
  0xaa   : > { %1262 = vrcp.f32 %v422_v36  ;;  %v487_v39 = vadd.f32 2.0, %v485_v37  ;;  %v486_v44 = vmul.f32 %v485_v37, %v478_v20 }
  0xab   : > { %1264 = vrcp.f32 %v423_v38 }
  0xac   : > { %1266 = vrcp.f32 %v487_v39 }
  0xb0   : > { %v1263_v41 = vpop.eup %1262 }
  0xb1   : > { %v1265_v43 = vpop.eup %1264  ;;  %v426_v45 = vmul.f32 %v1263_v41, %v420_v40 }
  0xb2   : > { %v1267_v46 = vpop.eup %1266  ;;  %v427_v47 = vmul.f32 %v1265_v43, %v421_v42 }
  0xb3   : > { %v489_v48 = vmul.f32 %v1267_v46, %v486_v44  ;;  %430 = vrot.lane.b32.xlu0 %v426_v45, %s1309_s17  ;;  %v428_v49 = vpack.c.bf16 %v426_v45, %v426_v45 }
  0xb4   : > { %450 = vrot.lane.b32.xlu2 %v427_v47, %s1310_s18  ;;  %432 = vrot.lane.b32.xlu1 %v427_v47, %s1309_s17  ;;  %v429_v50 = vpack.c.bf16 %v427_v47, %v427_v47 }
  0xb5   : > { %v504_v51 = vsel %vm377_vm0, %v428_v49, 0  ;;  %v491_v53 = vmul.f32 0.0, %v489_v48 }
  0xb6   : > { %516 = vmatpush.bf16.msra.mxu3 %v504_v51  ;;  %v507_v52 = vsel %vm377_vm0, %v429_v50, 0 }
  0xb7   : > { %529 = vmatpush.bf16.msrb.mxu0 %v507_v52  ;;  %v1407_v54 = vpack.c.bf16 %v491_v53, %v491_v53 }
  0xb9   : > { %1183 = vmatmul.msk.bf16.vlgmr.msra.gmra.mxu3 %vm373_vm1, %v1182_v55  ;;  %v868_v26 = vsel %vm377_vm0, %v1407_v54, 0 }
  0xba   : > { %1184 = vmatmul.msk.bf16.vlgmr.msrb.gmra.mxu0 %vm373_vm1, %v1182_v55 }
  0xbc   : > { %940 = vrot.lane.b32.xlu2 %v1407_v54, %s1310_s18  ;;  %448 = vrot.lane.b32.xlu1 %v426_v45, %s1310_s18 }
 0x10e   : > { %v451_v12 = vpop.permute.xlu2 %450 }
 0x116   : > { %v941_v27 = vpop.permute.xlu2 %940 }
 0x117   : > { %v946_v29 = vsel %vm377_vm0, %v941_v27, 0 }
 0x125   : > { %v431_v61 = vpop.permute.xlu0 %430 }
 0x126   : > { %v433_v62 = vpop.permute.xlu1 %432 }
 0x127   : > { %v437_v63 = vsel %vm436_vm2, %v431_v61, %v433_v62  ;;  %v438_v0 = vsel %vm436_vm2, %v433_v62, %v431_v61 }
 0x128   : > { %v444_v1 = vmul.f32 %v440_v59, %v438_v0  ;;  %v445_v2 = vmul.f32 %v441_v60, %v437_v63 }
 0x12a   : > { %v446_v5 = vpack.c.bf16 %v444_v1, %v444_v1  ;;  %v447_v6 = vpack.c.bf16 %v445_v2, %v445_v2  ;;  %v1207_v2 = vld [vmem:[%s1542_s5 + $0x4] sm:$0xf] }
 0x12c   : > { %v539_v7 = vsel %vm377_vm0, %v446_v5, 0  ;;  %v542_v8 = vsel %vm377_vm0, %v447_v6, 0 }
 0x12d   : > { %551 = vmatpush.bf16.msrb.mxu1 %v539_v7  ;;  %564 = vmatpush.bf16.msrb.mxu2 %v542_v8 }
 0x12e   : > { %v449_v13 = vpop.permute.xlu1 %448 }
 0x12f   : > { %v453_v14 = vsel %vm452_vm3, %v449_v13, %v451_v12  ;;  %v454_v15 = vsel %vm452_vm3, %v451_v12, %v449_v13 }
 0x130   : > { %v460_v16 = vmul.f32 %v456_v9, %v453_v14  ;;  %v461_v17 = vmul.f32 %v457_v10, %v454_v15  ;;  %1185 = vmatmul.msk.bf16.vlgmr.msrb.gmra.mxu1 %vm373_vm1, %v1181_v11  ;;  %1186 = vmatmul.msk.bf16.vlgmr.msrb.gmra.mxu2 %vm373_vm1, %v1181_v11 }
 0x131   : > { %622 = vmatpush.bf16.msra.mxu1 %v504_v51  ;;  %635 = vmatpush.bf16.msra.mxu2 %v507_v52 }
 0x132   : > { %v462_v18 = vpack.c.bf16 %v460_v16, %v460_v16  ;;  %v463_v19 = vpack.c.bf16 %v461_v17, %v461_v17 }
 0x134   : > { %v576_v20 = vsel %vm377_vm0, %v462_v18, 0  ;;  %v579_v21 = vsel %vm377_vm0, %v463_v19, 0 }
 0x135   : > { %588 = vmatpush.bf16.msrb.mxu3 %v576_v20  ;;  %601 = vmatpush.bf16.msra.mxu0 %v579_v21 }
 0x136   : > { %682 = vmatpush.bf16.msrb.mxu1 %v576_v20  ;;  %695 = vmatpush.bf16.msrb.mxu2 %v579_v21 }
 0x137   : > { %v531_v36 = vpop.f32.mrf.mxu0 }
 0x138   : > { %1188 = vmatmul.msk.bf16.vlgmr.msrb.gmra.mxu3 %vm373_vm1, %v1187_v22  ;;  %1189 = vmatmul.msk.bf16.vlgmr.msra.gmra.mxu0 %vm373_vm1, %v1187_v22 }
 0x139   : > { %651 = vmatpush.bf16.msra.mxu3 %v539_v7  ;;  %664 = vmatpush.bf16.msrb.mxu0 %v542_v8 }
 0x13c   : > { %v518_v37 = vpop.f32.mrf.mxu3 }
 0x13d   : > { %733 = vmatpush.bf16.msrb.mxu3 %v504_v51  ;;  %746 = vmatpush.bf16.msra.mxu0 %v507_v52 }
 0x13f   : > { %v533_v38 = vpop.f32.mrf.mxu0 }
 0x140   : > { %1191 = vmatmul.msk.bf16.vlgmr.msra.gmra.mxu1 %vm373_vm1, %v1190_v23  ;;  %1192 = vmatmul.msk.bf16.vlgmr.msra.gmra.mxu2 %vm373_vm1, %v1190_v23  ;;  %v1176_v38 = vld [vmem:[%s1539_s2 + $0x2] ss:$4 sm:$0x3] }
 0x141   : > { %762 = vmatpush.bf16.msra.mxu1 %v539_v7  ;;  %775 = vmatpush.bf16.msra.mxu2 %v542_v8 }
 0x144   : > { %v520_v39 = vpop.f32.mrf.mxu3 }
 0x148   : > { %1193 = vmatmul.msk.bf16.vlgmr.msra.gmra.mxu3 %vm373_vm1, %v609_v24  ;;  %1194 = vmatmul.msk.bf16.vlgmr.msrb.gmra.mxu0 %vm373_vm1, %v609_v24 }
 0x149   : > { %793 = vmatpush.bf16.msra.mxu3 %v576_v20  ;;  %806 = vmatpush.bf16.msrb.mxu0 %v579_v21 }
 0x150   : > { %1196 = vmatmul.msk.bf16.vlgmr.msrb.gmra.mxu1 %vm373_vm1, %v1195_v25  ;;  %1197 = vmatmul.msk.bf16.vlgmr.msrb.gmra.mxu2 %vm373_vm1, %v1195_v25 }
 0x151   : > { %877 = vmatpush.bf16.msrb.mxu1 %v868_v26  ;;  %894 = vmatpush.bf16.msrb.mxu2 %v868_v26 }
 0x158   : > { %1200 = vmatmul.msk.bf16.vlgmr.msrb.gmra.mxu3 %vm373_vm1, %v1199_v28  ;;  %1201 = vmatmul.msk.bf16.vlgmr.msra.gmra.mxu0 %vm373_vm1, %v1199_v28 }
 0x159   : > { %920 = vmatpush.bf16.msrb.mxu3 %v868_v26  ;;  %955 = vmatpush.bf16.msra.mxu0 %v946_v29 }
 0x160   : > { %1202 = vmatmul.msk.bf16.vlgmr.msra.gmra.mxu1 %vm373_vm1, %v1198_v30  ;;  %1203 = vmatmul.msk.bf16.vlgmr.msra.gmra.mxu2 %vm373_vm1, %v1198_v30 }
 0x161   : > { %972 = vmatpush.bf16.msra.mxu1 %v946_v29  ;;  %997 = vmatpush.bf16.msra.mxu2 %v946_v29 }
 0x168   : > { %1206 = vmatmul.msk.bf16.vlgmr.msrb.gmra.mxu0 %vm373_vm1, %v1204_v31  ;;  %1205 = vmatmul.msk.bf16.vlgmr.msra.gmra.mxu3 %vm373_vm1, %v1204_v31 }
 0x170   : > { %1208 = vmatmul.msk.bf16.vlgmr.msrb.gmra.mxu1 %vm373_vm1, %v863_v32  ;;  %1210 = vmatmul.msk.bf16.vlgmr.msrb.gmra.mxu2 %vm373_vm1, %v1209_v33  ;;  %v830_v32 = vld [vmem:[%s1543_s6] sm:$0xff] }
 0x178   : > { %1214 = vmatmul.msk.bf16.vlgmr.msra.gmra.mxu0 %vm373_vm1, %v1213_v34  ;;  %1211 = vmatmul.msk.bf16.vlgmr.msrb.gmra.mxu3 %vm373_vm1, %v1207_v2 }
 0x180   : > { %1216 = vmatmul.msk.bf16.vlgmr.msra.gmra.mxu1 %vm373_vm1, %v1215_v35  ;;  %1217 = vmatmul.msk.bf16.vlgmr.msra.gmra.mxu2 %vm373_vm1, %v1212_v56 }
 0x1ad   : > { %v553_v40 = vpop.f32.mrf.mxu1 }
 0x1ae   : > { %v554_v41 = vadd.f32 %v553_v40, %v518_v37 }
 0x1b3   : > { %v566_v42 = vpop.f32.mrf.mxu2 }
 0x1b4   : > { %v567_v43 = vadd.f32 %v566_v42, %v531_v36  ;;  %v711_v42 = vperm.slane %v1176_v38, 0 }
 0x1b5   : > { %v555_v44 = vpop.f32.mrf.mxu1  ;;  %v603_v45 = vpop.f32.mrf.mxu0 }
 0x1b6   : > { %v1490_v46 = vadd.f32 %v603_v45, %v567_v43  ;;  %v1177_v44 = vld [vmem:[%s1539_s2 + $0x3] ss:$4 sm:$0x3] }
 0x1b7   : > { %v822_v45 = vperm.slane %v1177_v44, 0  ;;  %v823_v2 = vperm.slane %v1177_v44, 1  ;;  %v856_v44 = vunpack.c.l.bf16 %v1391_v3 }
 0x1bb   : > { %v568_v47 = vpop.f32.mrf.mxu2  ;;  %v590_v48 = vpop.f32.mrf.mxu3 }
 0x1bc   : > { %v1492_v49 = vadd.f32 %v590_v48, %v554_v41 }
 0x1bd   : > { %v605_v50 = vpop.f32.mrf.mxu0  ;;  %v624_v51 = vpop.f32.mrf.mxu1 }
 0x1c3   : > { %v592_v52 = vpop.f32.mrf.mxu3  ;;  %v637_v53 = vpop.f32.mrf.mxu2 }
 0x1c5   : > { %v626_v54 = vpop.f32.mrf.mxu1  ;;  %v666_v55 = vpop.f32.mrf.mxu0 }
 0x1c6   : > { %v667_v25 = vadd.f32 %v666_v55, %v637_v53 }
 0x1cb   : > { %v639_v58 = vpop.f32.mrf.mxu2  ;;  %v653_v59 = vpop.f32.mrf.mxu3 }
 0x1cc   : > { %v654_v20 = vadd.f32 %v653_v59, %v624_v51 }
 0x1cd   : > { %v668_v60 = vpop.f32.mrf.mxu0  ;;  %v684_v61 = vpop.f32.mrf.mxu1 }
 0x1ce   : > { %v701_v22 = vadd.f32 %v684_v61, %v654_v20 }
 0x1d3   : > { %v697_v62 = vpop.f32.mrf.mxu2  ;;  %v655_v63 = vpop.f32.mrf.mxu3 }
 0x1d4   : > { %v702_v26 = vadd.f32 %v697_v62, %v667_v25  ;;  %v712_v62 = vperm.slane %v1176_v38, 1 }
 0x1d5   : > { %v686_v0 = vpop.f32.mrf.mxu1  ;;  %v748_v1 = vpop.f32.mrf.mxu0 }
 0x1db   : > { %v699_v4 = vpop.f32.mrf.mxu2  ;;  %v735_v5 = vpop.f32.mrf.mxu3 }
 0x1dd   : > { %v750_v6 = vpop.f32.mrf.mxu0  ;;  %v764_v7 = vpop.f32.mrf.mxu1 }
 0x1de   : > { %v765_v29 = vadd.f32 %v764_v7, %v735_v5 }
 0x1e3   : > { %v777_v8 = vpop.f32.mrf.mxu2  ;;  %v737_v9 = vpop.f32.mrf.mxu3 }
 0x1e4   : > { %v778_v28 = vadd.f32 %v777_v8, %v748_v1 }
 0x1e5   : > { %v766_v10 = vpop.f32.mrf.mxu1  ;;  %v808_v11 = vpop.f32.mrf.mxu0 }
 0x1e6   : > { %v813_v30 = vadd.f32 %v808_v11, %v778_v28 }
 0x1eb   : > { %v795_v12 = vpop.f32.mrf.mxu3  ;;  %v779_v13 = vpop.f32.mrf.mxu2 }
 0x1ec   : > { %v812_v31 = vadd.f32 %v795_v12, %v765_v29 }
 0x1ed   : > { %v810_v14 = vpop.f32.mrf.mxu0  ;;  %v879_v15 = vpop.f32.mrf.mxu1 }
 0x1f3   : > { %v896_v16 = vpop.f32.mrf.mxu2  ;;  %v797_v17 = vpop.f32.mrf.mxu3 }
 0x1f5   : > { %v881_v18 = vpop.f32.mrf.mxu1  ;;  %v957_v19 = vpop.f32.mrf.mxu0 }
 0x1f6   : > { %982 = vrot.lane.b32.xlu1 %v957_v19, %s1311_s21  ;;  %979 = vrot.lane.b32.xlu0 %v957_v19, %s1312_s22 }
 0x1fb   : > { %v898_v21 = vpop.f32.mrf.mxu2  ;;  %v922_v35 = vpop.f32.mrf.mxu3 }
 0x1fd   : > { %v974_v23 = vpop.f32.mrf.mxu1  ;;  %v959_v24 = vpop.f32.mrf.mxu0 }
 0x1fe   : > { %1007 = vrot.lane.b32.xlu0 %v974_v23, %s1313_s23  ;;  %1004 = vrot.lane.b32.xlu2 %v974_v23, %s1314_s28 }
 0x1ff   : > { %703 = vrot.lane.b32.xlu1 %v701_v22, %s1311_s21 }
 0x203   : > { %v999_v33 = vpop.f32.mrf.mxu2  ;;  %v924_v37 = vpop.f32.mrf.mxu3 }
 0x205   : > { %v976_v27 = vpop.f32.mrf.mxu1 }
 0x206   : > { %901 = vrot.lane.b32.xlu0 %v879_v15, %s1312_s22  ;;  %705 = vrot.lane.b32.xlu2 %v702_v26, %s1311_s21 }
 0x207   : > { %904 = vrot.lane.b32.xlu1 %v879_v15, %s1311_s21 }
 0x20b   : > { %v1001_v34 = vpop.f32.mrf.mxu2 }
 0x20e   : > { %816 = vrot.lane.b32.xlu0 %v813_v30, %s1314_s28  ;;  %814 = vrot.lane.b32.xlu2 %v812_v31, %s1314_s28 }
 0x20f   : > { %927 = vrot.lane.b32.xlu1 %v896_v16, %s1314_s28 }
 0x216   : > { %930 = vrot.lane.b32.xlu2 %v896_v16, %s1313_s23 }
 0x217   : > { %833 = vperm.xlu1 %1254, %v830_v32  }
 0x21e   : > { %1017 = vperm.xlu2 %1255, %v830_v32  }
 0x258   : > { %v1005_v36 = vpop.permute.xlu2 %1004 }
 0x260   : > { %v706_v41 = vpop.permute.xlu2 %705 }
 0x268   : > { %v983_v39 = vpop.permute.xlu1 %982  ;;  %v980_v40 = vpop.permute.xlu0 %979 }
 0x269   : > { %v985_v43 = vsel %vm907_vm4, %v980_v40, %v983_v39  ;;  %v815_v54 = vpop.permute.xlu2 %814  ;;  %v1030_v40 = vld [vmem:[%s1385_s11] sm:$0xff]  }
 0x26a   : > { %v986_v47 = vmul.f32 %v985_v43, %v711_v42  ;;  %v1031_v43 = vunpack.c.l.bf16 %v1030_v40 }
 0x26c   : > { %v1000_v53 = vadd.f32 %v999_v33, %v986_v47 }
 0x270   : > { %v1008_v48 = vpop.permute.xlu0 %1007 }
 0x271   : > { %v1010_v50 = vsel %vm933_vm5, %v1005_v36, %v1008_v48  ;;  %v704_v51 = vpop.permute.xlu1 %703  ;;  %v931_v61 = vpop.permute.xlu2 %930 }
 0x272   : > { %v1011_v52 = vmul.f32 %v1010_v50, %v822_v45  ;;  %v709_v59 = vsel %vm707_vm6, %v706_v41, %v704_v51  ;;  %v708_v0 = vsel %vm707_vm6, %v704_v51, %v706_v41  ;;  %v857_v50 = vunpack.c.h.bf16 %v1391_v3 }
 0x273   : > { %v715_v63 = vmul.f32 %v711_v42, %v709_v59  ;;  %v716_v8 = vmul.f32 %v712_v62, %v708_v0 }
 0x274   : > { %v1012_v55 = vadd.f32 %v1011_v52, %v1000_v53 }
 0x275   : > { %v717_v9 = vadd.f32 %v715_v63, %v1492_v49  ;;  %v718_v57 = vadd.f32 %v716_v8, %v1490_v46 }
 0x276   : > { %1037 = vrot.lane.b32.xlu0 %v1012_v55, %s1310_s18 }
 0x278   : > { %v902_v56 = vpop.permute.xlu0 %901 }
 0x279   : > { %v905_v58 = vpop.permute.xlu1 %904  ;;  %v1018_v17 = vpop.permute.xlu2 %1017 }
 0x27a   : > { %v908_v60 = vsel %vm907_vm4, %v902_v56, %v905_v58 }
 0x27b   : > { %v909_v1 = vmul.f32 %v908_v60, %v711_v42 }
 0x27d   : > { %v923_v12 = vadd.f32 %v922_v35, %v909_v1 }
 0x27e   : > { %1044 = vperm.xlu0 %1253, %v830_v32  }
 0x280   : > { %v817_v4 = vpop.permute.xlu0 %816 }
 0x281   : > { %v819_v5 = vsel %vm818_vm7, %v815_v54, %v817_v4  ;;  %v820_v6 = vsel %vm818_vm7, %v817_v4, %v815_v54  ;;  %v928_v7 = vpop.permute.xlu1 %927 }
 0x282   : > { %v826_v10 = vmul.f32 %v822_v45, %v819_v5  ;;  %v934_v11 = vsel %vm933_vm5, %v928_v7, %v931_v61  ;;  %v827_v14 = vmul.f32 %v823_v2, %v820_v6  ;;  %v1058_v7 = vunpack.c.h.bf16 %v1030_v40 }
 0x283   : > { %v935_v13 = vmul.f32 %v934_v11, %v822_v45 }
 0x284   : > { %v828_v15 = vadd.f32 %v826_v10, %v717_v9  ;;  %v829_v19 = vadd.f32 %v827_v14, %v718_v57 }
 0x285   : > { %v936_v16 = vadd.f32 %v935_v13, %v923_v12 }
 0x287   : > { %v1013_v18 = vadd.f32 %v936_v16, %v828_v15 }
 0x289   : > { %v1020_v20 = vadd.f32 %v1018_v17, %v1013_v18  ;;  %v834_v21 = vpop.permute.xlu1 %833 }
 0x28a   : > { %v836_v22 = vadd.f32 %v834_v21, %v828_v15  ;;  %v837_v23 = vadd.f32 %v834_v21, %v829_v19 }
 0x28b   : > { %v1021_v24 = vmin.f32 %v1020_v20, 20.0 }
 0x28c   : > { %v838_v25 = vmin.f32 %v836_v22, 20.0  ;;  %v839_v49 = vmin.f32 %v837_v23, 20.0 }
 0x28d   : > { %v1022_v26 = vmul.f32 1.442695, %v1021_v24 }
 0x28e   : > { %v840_v27 = vmul.f32 1.442695, %v838_v25  ;;  %v842_v28 = vmul.f32 1.442695, %v839_v49 }
 0x28f   : > { %1268 = vpow2.f32 %v1022_v26 }
 0x290   : > { %1270 = vpow2.f32 %v840_v27 }
 0x291   : > { %1272 = vpow2.f32 %v842_v28 }
 0x295   : > { %v1269_v29 = vpop.eup %1268 }
 0x296   : > { %v1271_v30 = vpop.eup %1270  ;;  %v1024_v31 = vadd.f32 2.0, %v1269_v29 }
 0x297   : > { %v1273_v46 = vpop.eup %1272  ;;  %v844_v32 = vadd.f32 2.0, %v1271_v30 }
 0x298   : > { %v1025_v33 = vmul.f32 %v1269_v29, %v1024_v31  ;;  %v845_v34 = vadd.f32 2.0, %v1273_v46 }
 0x299   : > { %v846_v35 = vmul.f32 %v1271_v30, %v844_v32 }
 0x29a   : > { %v1027_v36 = vadd.f32 2.0, %v1025_v33  ;;  %v847_v37 = vmul.f32 %v1273_v46, %v845_v34  ;;  %v1026_v41 = vmul.f32 %v1025_v33, %v1020_v20 }
 0x29b   : > { %v850_v38 = vadd.f32 2.0, %v846_v35  ;;  %v848_v45 = vmul.f32 %v846_v35, %v836_v22 }
 0x29c   : > { %1274 = vrcp.f32 %v1027_v36  ;;  %v851_v39 = vadd.f32 2.0, %v847_v37  ;;  %v849_v51 = vmul.f32 %v847_v37, %v837_v23 }
 0x29d   : > { %1276 = vrcp.f32 %v850_v38 }
 0x29e   : > { %1278 = vrcp.f32 %v851_v39 }
 0x2a2   : > { %v1275_v42 = vpop.eup %1274 }
 0x2a3   : > { %v1277_v47 = vpop.eup %1276  ;;  %v1029_v48 = vmul.f32 %v1275_v42, %v1026_v41 }
 0x2a4   : > { %v1279_v52 = vpop.eup %1278  ;;  %v854_v53 = vmul.f32 %v1277_v47, %v848_v45 }
 0x2a5   : > { %v855_v54 = vmul.f32 %v1279_v52, %v849_v51  ;;  %v1032_v55 = vadd.f32 %v1031_v43, %v1029_v48 }
 0x2a6   : > { %v858_v56 = vadd.f32 %v856_v44, %v854_v53 }
 0x2a7   : > { %v859_v58 = vadd.f32 %v857_v50, %v855_v54  ;;  %v1033_v60 = vpack.c.bf16 %v1032_v55, %v1032_v55 }
 0x2a9   : > { %v860_v59 = vpack.c.bf16 %v859_v58, %v858_v56 }
 0x2ab   : > { %861 = vst [vmem:[%s344_s14] sm:$0xff] %v860_v59 }
 0x2ac   : > { %1035 = vst.msk [vmem:[%s344_s14] sm:$0xf] %vm1034_vm8, %v1033_v60 }
 0x2e8   : > { %v1038_v61 = vpop.permute.xlu0 %1037 }
 0x2e9   : > { %v1040_v62 = vadd.f32 %v1038_v61, %v829_v19 }
 0x2f0   : > { %v1045_v3 = vpop.permute.xlu0 %1044 }
 0x2f1   : > { %v1047_v63 = vadd.f32 %v1045_v3, %v1040_v62 }
 0x2f3   : > { %v1048_v0 = vmin.f32 %v1047_v63, 20.0 }
 0x2f5   : > { %v1049_v1 = vmul.f32 1.442695, %v1048_v0 }
 0x2f7   : > { %1280 = vpow2.f32 %v1049_v1 }
 0x2fd   : > { %v1281_v2 = vpop.eup %1280 }
 0x2fe   : > { %v1051_v4 = vadd.f32 2.0, %v1281_v2 }
 0x300   : > { %v1052_v5 = vmul.f32 %v1281_v2, %v1051_v4 }
 0x302   : > { %v1054_v6 = vadd.f32 2.0, %v1052_v5  ;;  %v1053_v8 = vmul.f32 %v1052_v5, %v1047_v63 }
 0x304   : > { %1282 = vrcp.f32 %v1054_v6 }
 0x30a   : > { %v1283_v9 = vpop.eup %1282 }
 0x30b   : > { %v1056_v10 = vmul.f32 %v1283_v9, %v1053_v8 }
 0x30d   : > { %v1059_v11 = vadd.f32 %v1058_v7, %v1056_v10 }
 0x30f   : > { %v1060_v12 = vpack.c.bf16 %v1059_v11, %v1059_v11 }
 0x311   : > { %1062 = vst.msk [vmem:[%s344_s14 + $0x4] sm:$0xf] %vm1061_vm9, %v1060_v12 }
 0x312 PF: > { %s17_s26 = sadd.s32 1, %s1306_s26   ;;  %s1545_s24 = smov %s1302_s25 }
 0x313   : > { %p14_p5 = scmp.ge.s32.totalorder %s17_s26, 4   ;;  %s1546_s25 = smov %s1548_s27 }
 0x315   :  { %16 = sbr.rel (!%p14_p5) target bundleno = 2 (0x2), region = 92 }

</bundles_post_ra>
